<compile_context>
chip_gen: v7x
topology: tpu7x:2x2x1
jax: 0.10.0
libtpu: 0.0.40
codegen_flags: <defaults>
</compile_context>

<pallas_src>
import jax
import jax.numpy as jnp
from jax.experimental import pallas as pl
from jax.experimental.pallas import tpu as pltpu

NUM_CLASSES = 10
EXPANSION = 4
EPS = 1e-5

_ROW_TARGET = 2048                 # target matmul rows (M) per grid step
_VMEM_BUDGET = 24 * 1024 * 1024    # keep block+scratch estimate under this


def bottleneck_kernel(x_ref, w1_ref, w2_ref, w3_ref, b1_ref, b2_ref, b3_ref,
                      out_ref, pad_ref):
    NB, H, W, Cin = x_ref.shape
    P = w1_ref.shape[1]
    M = NB * H * W

    # Residual / conv1 input, flattened to (M, Cin) — bf16, lane-dense (Cin==128).
    x = x_ref[...].reshape(M, Cin)

    # --- conv1 (1x1, BN1 scale folded into w1) + bias + relu -----------------
    o1 = jnp.dot(x, w1_ref[...], preferred_element_type=jnp.float32)
    o1 = jnp.maximum(o1 + b1_ref[...], 0.0)                       # (M, P) f32

    # --- conv2 (3x3, stride 1, pad 1) as a single im2col matmul --------------
    # Zero only the 1-pixel halo every step (interior is fully rewritten below,
    # so no stale data can leak; per-step zeroing keeps this correct when the
    # grid is sharded across v7x's two cores under "parallel" semantics).
    zrow = jnp.zeros((NB, 1, W + 2, P), jnp.bfloat16)
    zcol = jnp.zeros((NB, H, 1, P), jnp.bfloat16)
    pad_ref[:, 0:1, :, :] = zrow
    pad_ref[:, H + 1:H + 2, :, :] = zrow
    pad_ref[:, 1:H + 1, 0:1, :] = zcol
    pad_ref[:, 1:H + 1, W + 1:W + 2, :] = zcol
    pad_ref[:, 1:H + 1, 1:W + 1, :] = o1.reshape(NB, H, W, P).astype(jnp.bfloat16)

    # im2col: (M, 9*P) bf16 patch matrix, ordered (ky, kx, cin) to match w2.
    cols = jnp.concatenate(
        [pad_ref[:, ky:ky + H, kx:kx + W, :].reshape(M, P)
         for ky in range(3) for kx in range(3)], axis=-1)         # (M, 9P) bf16
    o2 = jnp.dot(cols, w2_ref[...], preferred_element_type=jnp.float32)
    o2 = jnp.maximum(o2 + b2_ref[...], 0.0)                       # (M, P) f32

    # --- conv3 (1x1, BN3 scale folded) + bias + residual + relu --------------
    o3 = jnp.dot(o2.astype(jnp.bfloat16), w3_ref[...],
                 preferred_element_type=jnp.float32)
    o3 = jnp.maximum(o3 + b3_ref[...] + x.astype(jnp.float32), 0.0)  # (M, Cin)

    out_ref[...] = o3.reshape(NB, H, W, Cin).astype(out_ref.dtype)


def _vmem_bytes_estimate(nb, H, W, Cin, P):
    """Rough per-step VMEM footprint (bf16 blocks double-buffered + scratch)."""
    m = nb * H * W
    act_blk = m * Cin * 2                          # bf16 in or out block
    pad = nb * (H + 2) * (W + 2) * P * 2           # bf16 conv2 scratch
    cols = m * 9 * P * 2                           # bf16 im2col matrix
    f32_tmp = 3 * m * max(Cin, P) * 4              # o1/o2/o3 f32 intermediates
    weights = (Cin * P + 9 * P * P + P * Cin) * 2 + (2 * P + Cin) * 4
    return 2 * act_blk * 2 + pad + cols + f32_tmp + 2 * weights


def _pick_batch_group(N, H, W, Cin, P):
    """Images per grid step: ~2048 matmul rows, >=2 grid steps, VMEM-bounded."""
    nb = max(1, _ROW_TARGET // (H * W))
    if N >= 2:
        nb = min(nb, N // 2)       # >= 2 steps so v7x megacore has work to split
    nb = max(nb, 1)
    while nb > 1 and _vmem_bytes_estimate(nb, H, W, Cin, P) > _VMEM_BUDGET:
        nb -= 1
    return nb


def bottleneck_forward_nhwc(x, params):
    """x: (N, H, W, Cin) NHWC (any float dtype; cast to bf16). Returns bf16."""
    w1, w2, w3, b1, b2, b3 = params
    N, H, W, Cin = x.shape
    P = w1.shape[1]
    assert Cin == w1.shape[0]

    x = x.astype(jnp.bfloat16)     # bf16 activation I/O: kernel is HBM-bound

    nb = _pick_batch_group(N, H, W, Cin, P)
    g = -(-N // nb)                # ceil-div; non-divisor N handled by padding
    n_pad = g * nb
    if n_pad != N:
        x = jnp.concatenate(
            [x, jnp.zeros((n_pad - N, H, W, Cin), x.dtype)], axis=0)

    est = _vmem_bytes_estimate(nb, H, W, Cin, P)
    vmem_limit = int(min(max(2 * est, 32 * 1024 * 1024), 60 * 1024 * 1024))

    def _full_spec(a):
        nd = a.ndim
        return pl.BlockSpec(a.shape, lambda n, _nd=nd: (0,) * _nd)

    out = pl.pallas_call(
        bottleneck_kernel,
        out_shape=jax.ShapeDtypeStruct((n_pad, H, W, Cin), jnp.bfloat16),
        grid_spec=pltpu.PrefetchScalarGridSpec(
            num_scalar_prefetch=0,
            grid=(g,),
            in_specs=[pl.BlockSpec((nb, H, W, Cin), lambda n: (n, 0, 0, 0)),
                      _full_spec(w1), _full_spec(w2), _full_spec(w3),
                      _full_spec(b1), _full_spec(b2), _full_spec(b3)],
            out_specs=pl.BlockSpec((nb, H, W, Cin), lambda n: (n, 0, 0, 0)),
            scratch_shapes=[pltpu.VMEM((nb, H + 2, W + 2, P), jnp.bfloat16)]),
        compiler_params=pltpu.CompilerParams(
            dimension_semantics=("parallel",),   # batch groups shard on v7x cores
            vmem_limit_bytes=vmem_limit),
    )(x, w1, w2, w3, b1, b2, b3)

    return out[:N] if n_pad != N else out


def bottleneck_forward(x_nchw, params):
    """NCHW adapter for drop-in parity with the PyTorch module.
    Prefer bottleneck_forward_nhwc end-to-end to avoid per-call transposes."""
    # Mirrors the PyTorch quirk `if len(x[0]) == self.num_classes: return x`
    # (silently skips compute if the channel dim happens to equal 10).
    if x_nchw.shape[1] == NUM_CLASSES:
        return x_nchw
    x = jnp.transpose(x_nchw, (0, 2, 3, 1))
    out = bottleneck_forward_nhwc(x, params)
    return jnp.transpose(out, (0, 3, 1, 2))


def make_params(key, inplanes, planes):
    """Conv weights + inference BN params; BN scales folded into conv output
    channels offline; weights pre-cast to bf16 (halves weight DMA)."""
    P4 = planes * EXPANSION
    assert P4 == inplanes, "no-downsample Bottleneck requires inplanes == planes*4"
    ks = jax.random.split(key, 15)
    w1 = 0.1 * jax.random.normal(ks[0], (inplanes, planes), jnp.float32)       # 1x1 (Cin, P)
    w2 = 0.1 * jax.random.normal(ks[1], (3, 3, planes, planes), jnp.float32)   # 3x3 HWIO
    w3 = 0.1 * jax.random.normal(ks[2], (planes, P4), jnp.float32)             # 1x1 (P, 4P)

    def bn(kg, kb, km, kv, c):
        gamma = 1.0 + 0.1 * jax.random.normal(kg, (c,), jnp.float32)
        beta = 0.1 * jax.random.normal(kb, (c,), jnp.float32)
        mean = 0.1 * jax.random.normal(km, (c,), jnp.float32)
        var = jnp.abs(jax.random.normal(kv, (c,), jnp.float32)) + 0.5
        scale = gamma / jnp.sqrt(var + EPS)
        shift = beta - mean * scale
        return scale, shift

    s1, b1 = bn(ks[3], ks[4], ks[5], ks[6], planes)
    s2, b2 = bn(ks[7], ks[8], ks[9], ks[10], planes)
    s3, b3 = bn(ks[11], ks[12], ks[13], ks[14], P4)

    w1f = (w1 * s1[None, :]).astype(jnp.bfloat16)                              # (Cin, P)
    w2f = (w2.reshape(9 * planes, planes) * s2[None, :]).astype(jnp.bfloat16)  # (9P, P)
    w3f = (w3 * s3[None, :]).astype(jnp.bfloat16)                              # (P, 4P)
    return (w1f, w2f, w3f,
            b1.reshape(1, planes), b2.reshape(1, planes), b3.reshape(1, P4))


def ref_forward_nhwc(x, params):
    """Pure-JAX reference mirroring the kernel numerics (bf16 matmul operands,
    f32 accumulation, f32 residual add, bf16 output)."""
    w1, w2, w3, b1, b2, b3 = params
    Cin, P = w1.shape
    dn = ('NHWC', 'HWIO', 'NHWC')
    hp = jax.lax.Precision.HIGHEST

    def conv(v, w, pad):
        return jax.lax.conv_general_dilated(
            v.astype(jnp.float32), w.astype(jnp.float32), (1, 1), pad,
            dimension_numbers=dn, precision=hp)

    xf = x.astype(jnp.float32)
    o = conv(x, w1.reshape(1, 1, Cin, P), 'VALID')
    o = jnp.maximum(o + b1[0], 0.0)
    o = conv(o.astype(jnp.bfloat16), w2.reshape(3, 3, P, P), [(1, 1), (1, 1)])
    o = jnp.maximum(o + b2[0], 0.0)
    o = conv(o.astype(jnp.bfloat16), w3.reshape(1, 1, P, Cin), 'VALID')
    o = jnp.maximum(o + b3[0] + xf, 0.0)
    return o.astype(jnp.bfloat16)


if __name__ == "__main__":
    key = jax.random.PRNGKey(0)
    kx, kp = jax.random.split(key)
    N, planes, Hs, Ws = 2, 32, 8, 8
    inplanes = planes * EXPANSION            # 128 -> lane-dense channel dim
    x = jax.random.normal(kx, (N, Hs, Ws, inplanes),
                          jnp.float32).astype(jnp.bfloat16)         # NHWC bf16
    params = make_params(kp, inplanes, planes)

    out = jax.block_until_ready(bottleneck_forward_nhwc(x, params))
    ref = ref_forward_nhwc(x, params)

    assert out.shape == (N, Hs, Ws, inplanes) and out.dtype == jnp.bfloat16
    o32, r32 = out.astype(jnp.float32), ref.astype(jnp.float32)
    err = float(jnp.max(jnp.abs(o32 - r32)))
    assert bool(jnp.allclose(o32, r32, atol=1e-1, rtol=5e-2)), err

    # NCHW adapter parity (PyTorch-style interface).
    out_nchw = jax.block_until_ready(
        bottleneck_forward(jnp.transpose(x, (0, 3, 1, 2)), params))
    assert bool(jnp.allclose(
        jnp.transpose(out_nchw, (0, 2, 3, 1)).astype(jnp.float32), o32,
        atol=1e-6, rtol=1e-6))

    # Early-return quirk: channel dim == num_classes skips all compute.
    x10 = jnp.zeros((2, NUM_CLASSES, 4, 4), jnp.float32)
    assert bottleneck_forward(x10, params) is x10

    print("KERNEL_OK")
</pallas_src>

<mosaic_0001>
module attributes {stable_mosaic.version = 11 : i64} {
  func.func @bottleneck_kernel(%arg0: i32, %arg1: memref<1x8x8x128xbf16, #tpu.memory_space<vmem>>, %arg2: memref<128x32xbf16, #tpu.memory_space<vmem>>, %arg3: memref<288x32xbf16, #tpu.memory_space<vmem>>, %arg4: memref<32x128xbf16, #tpu.memory_space<vmem>>, %arg5: memref<1x32xf32, #tpu.memory_space<vmem>>, %arg6: memref<1x32xf32, #tpu.memory_space<vmem>>, %arg7: memref<1x128xf32, #tpu.memory_space<vmem>>, %arg8: memref<1x8x8x128xbf16, #tpu.memory_space<vmem>>, %arg9: memref<1x10x10x32xbf16, #tpu.memory_space<vmem>>) attributes {dimension_semantics = [#tpu.dimension_semantics<parallel>], iteration_bounds = array<i64: 2>, scalar_prefetch = 0 : i64, scratch_operands = 1 : i64, tpu.core_type = #tpu.core_type<tc>, window_params = [{transform_indices = @transform_0, window_bounds = array<i64: 1, 8, 8, 128>}, {pipeline_mode = #tpu.pipeline_mode<synchronous>, transform_indices = @transform_1, window_bounds = array<i64: 128, 32>}, {pipeline_mode = #tpu.pipeline_mode<synchronous>, transform_indices = @transform_2, window_bounds = array<i64: 288, 32>}, {pipeline_mode = #tpu.pipeline_mode<synchronous>, transform_indices = @transform_3, window_bounds = array<i64: 32, 128>}, {pipeline_mode = #tpu.pipeline_mode<synchronous>, transform_indices = @transform_4, window_bounds = array<i64: 1, 32>}, {pipeline_mode = #tpu.pipeline_mode<synchronous>, transform_indices = @transform_5, window_bounds = array<i64: 1, 32>}, {pipeline_mode = #tpu.pipeline_mode<synchronous>, transform_indices = @transform_6, window_bounds = array<i64: 1, 128>}, {transform_indices = @transform_7, window_bounds = array<i64: 1, 8, 8, 128>}]} {
    %c0 = arith.constant 0 : index
    %c0_0 = arith.constant 0 : index
    %c0_1 = arith.constant 0 : index
    %c0_2 = arith.constant 0 : index
    %0 = vector.load %arg1[%c0, %c0_0, %c0_1, %c0_2] : memref<1x8x8x128xbf16, #tpu.memory_space<vmem>>, vector<1x8x8x128xbf16>
    %1 = vector.shape_cast %0 : vector<1x8x8x128xbf16> to vector<64x128xbf16>
    %c0_3 = arith.constant 0 : index
    %c0_4 = arith.constant 0 : index
    %2 = vector.load %arg2[%c0_3, %c0_4] : memref<128x32xbf16, #tpu.memory_space<vmem>>, vector<128x32xbf16>
    %cst = arith.constant dense<0.000000e+00> : vector<64x32xf32>
    %3 = tpu.matmul %1, %2, %cst {dimension_numbers = #tpu.dot_dimension_numbers<[1], [0], [0], [1], [0, 0, 1, 1], [], []>} : vector<64x128xbf16>, vector<128x32xbf16>, vector<64x32xf32> -> vector<64x32xf32>
    %c0_5 = arith.constant 0 : index
    %c0_6 = arith.constant 0 : index
    %4 = vector.load %arg5[%c0_5, %c0_6] : memref<1x32xf32, #tpu.memory_space<vmem>>, vector<1x32xf32>
    %5 = vector.broadcast %4 : vector<1x32xf32> to vector<64x32xf32>
    %6 = arith.addf %3, %5 : vector<64x32xf32>
    %cst_7 = arith.constant 0.000000e+00 : f32
    %7 = vector.broadcast %cst_7 : f32 to vector<64x32xf32>
    %8 = arith.maximumf %6, %7 : vector<64x32xf32>
    %cst_8 = arith.constant 0.000000e+00 : bf16
    %9 = vector.broadcast %cst_8 : bf16 to vector<1x1x10x32xbf16>
    %cst_9 = arith.constant 0.000000e+00 : bf16
    %10 = vector.broadcast %cst_9 : bf16 to vector<1x8x1x32xbf16>
    %c0_10 = arith.constant 0 : index
    %c0_11 = arith.constant 0 : index
    %c0_12 = arith.constant 0 : index
    %c0_13 = arith.constant 0 : index
    %11 = vector.load %arg9[%c0_10, %c0_11, %c0_12, %c0_13] : memref<1x10x10x32xbf16, #tpu.memory_space<vmem>>, vector<1x1x10x32xbf16>
    tpu.vector_store %arg9[%c0_10, %c0_11, %c0_12, %c0_13], %9 {strides = array<i32>} : memref<1x10x10x32xbf16, #tpu.memory_space<vmem>>, vector<1x1x10x32xbf16>,
    %c0_14 = arith.constant 0 : index
    %c9 = arith.constant 9 : index
    %c0_15 = arith.constant 0 : index
    %c0_16 = arith.constant 0 : index
    %12 = vector.load %arg9[%c0_14, %c9, %c0_15, %c0_16] : memref<1x10x10x32xbf16, #tpu.memory_space<vmem>>, vector<1x1x10x32xbf16>
    tpu.vector_store %arg9[%c0_14, %c9, %c0_15, %c0_16], %9 {strides = array<i32>} : memref<1x10x10x32xbf16, #tpu.memory_space<vmem>>, vector<1x1x10x32xbf16>,
    %c0_17 = arith.constant 0 : index
    %c1 = arith.constant 1 : index
    %c0_18 = arith.constant 0 : index
    %c0_19 = arith.constant 0 : index
    %13 = vector.load %arg9[%c0_17, %c1, %c0_18, %c0_19] : memref<1x10x10x32xbf16, #tpu.memory_space<vmem>>, vector<1x8x1x32xbf16>
    tpu.vector_store %arg9[%c0_17, %c1, %c0_18, %c0_19], %10 {strides = array<i32>} : memref<1x10x10x32xbf16, #tpu.memory_space<vmem>>, vector<1x8x1x32xbf16>,
    %c0_20 = arith.constant 0 : index
    %c1_21 = arith.constant 1 : index
    %c9_22 = arith.constant 9 : index
    %c0_23 = arith.constant 0 : index
    %14 = vector.load %arg9[%c0_20, %c1_21, %c9_22, %c0_23] : memref<1x10x10x32xbf16, #tpu.memory_space<vmem>>, vector<1x8x1x32xbf16>
    tpu.vector_store %arg9[%c0_20, %c1_21, %c9_22, %c0_23], %10 {strides = array<i32>} : memref<1x10x10x32xbf16, #tpu.memory_space<vmem>>, vector<1x8x1x32xbf16>,
    %15 = vector.shape_cast %8 : vector<64x32xf32> to vector<1x8x8x32xf32>
    %16 = arith.truncf %15 : vector<1x8x8x32xf32> to vector<1x8x8x32xbf16>
    %c0_24 = arith.constant 0 : index
    %c1_25 = arith.constant 1 : index
    %c1_26 = arith.constant 1 : index
    %c0_27 = arith.constant 0 : index
    %17 = vector.load %arg9[%c0_24, %c1_25, %c1_26, %c0_27] : memref<1x10x10x32xbf16, #tpu.memory_space<vmem>>, vector<1x8x8x32xbf16>
    tpu.vector_store %arg9[%c0_24, %c1_25, %c1_26, %c0_27], %16 {strides = array<i32>} : memref<1x10x10x32xbf16, #tpu.memory_space<vmem>>, vector<1x8x8x32xbf16>,
    %c0_28 = arith.constant 0 : index
    %c0_29 = arith.constant 0 : index
    %c0_30 = arith.constant 0 : index
    %c0_31 = arith.constant 0 : index
    %18 = vector.load %arg9[%c0_28, %c0_29, %c0_30, %c0_31] : memref<1x10x10x32xbf16, #tpu.memory_space<vmem>>, vector<1x8x8x32xbf16>
    %19 = vector.shape_cast %18 : vector<1x8x8x32xbf16> to vector<64x32xbf16>
    %c0_32 = arith.constant 0 : index
    %c0_33 = arith.constant 0 : index
    %c1_34 = arith.constant 1 : index
    %c0_35 = arith.constant 0 : index
    %20 = vector.load %arg9[%c0_32, %c0_33, %c1_34, %c0_35] : memref<1x10x10x32xbf16, #tpu.memory_space<vmem>>, vector<1x8x8x32xbf16>
    %21 = vector.shape_cast %20 : vector<1x8x8x32xbf16> to vector<64x32xbf16>
    %c0_36 = arith.constant 0 : index
    %c0_37 = arith.constant 0 : index
    %c2 = arith.constant 2 : index
    %c0_38 = arith.constant 0 : index
    %22 = vector.load %arg9[%c0_36, %c0_37, %c2, %c0_38] : memref<1x10x10x32xbf16, #tpu.memory_space<vmem>>, vector<1x8x8x32xbf16>
    %23 = vector.shape_cast %22 : vector<1x8x8x32xbf16> to vector<64x32xbf16>
    %c0_39 = arith.constant 0 : index
    %c1_40 = arith.constant 1 : index
    %c0_41 = arith.constant 0 : index
    %c0_42 = arith.constant 0 : index
    %24 = vector.load %arg9[%c0_39, %c1_40, %c0_41, %c0_42] : memref<1x10x10x32xbf16, #tpu.memory_space<vmem>>, vector<1x8x8x32xbf16>
    %25 = vector.shape_cast %24 : vector<1x8x8x32xbf16> to vector<64x32xbf16>
    %c0_43 = arith.constant 0 : index
    %c1_44 = arith.constant 1 : index
    %c1_45 = arith.constant 1 : index
    %c0_46 = arith.constant 0 : index
    %26 = vector.load %arg9[%c0_43, %c1_44, %c1_45, %c0_46] : memref<1x10x10x32xbf16, #tpu.memory_space<vmem>>, vector<1x8x8x32xbf16>
    %27 = vector.shape_cast %26 : vector<1x8x8x32xbf16> to vector<64x32xbf16>
    %c0_47 = arith.constant 0 : index
    %c1_48 = arith.constant 1 : index
    %c2_49 = arith.constant 2 : index
    %c0_50 = arith.constant 0 : index
    %28 = vector.load %arg9[%c0_47, %c1_48, %c2_49, %c0_50] : memref<1x10x10x32xbf16, #tpu.memory_space<vmem>>, vector<1x8x8x32xbf16>
    %29 = vector.shape_cast %28 : vector<1x8x8x32xbf16> to vector<64x32xbf16>
    %c0_51 = arith.constant 0 : index
    %c2_52 = arith.constant 2 : index
    %c0_53 = arith.constant 0 : index
    %c0_54 = arith.constant 0 : index
    %30 = vector.load %arg9[%c0_51, %c2_52, %c0_53, %c0_54] : memref<1x10x10x32xbf16, #tpu.memory_space<vmem>>, vector<1x8x8x32xbf16>
    %31 = vector.shape_cast %30 : vector<1x8x8x32xbf16> to vector<64x32xbf16>
    %c0_55 = arith.constant 0 : index
    %c2_56 = arith.constant 2 : index
    %c1_57 = arith.constant 1 : index
    %c0_58 = arith.constant 0 : index
    %32 = vector.load %arg9[%c0_55, %c2_56, %c1_57, %c0_58] : memref<1x10x10x32xbf16, #tpu.memory_space<vmem>>, vector<1x8x8x32xbf16>
    %33 = vector.shape_cast %32 : vector<1x8x8x32xbf16> to vector<64x32xbf16>
    %c0_59 = arith.constant 0 : index
    %c2_60 = arith.constant 2 : index
    %c2_61 = arith.constant 2 : index
    %c0_62 = arith.constant 0 : index
    %34 = vector.load %arg9[%c0_59, %c2_60, %c2_61, %c0_62] : memref<1x10x10x32xbf16, #tpu.memory_space<vmem>>, vector<1x8x8x32xbf16>
    %35 = vector.shape_cast %34 : vector<1x8x8x32xbf16> to vector<64x32xbf16>
    %36 = tpu.concatenate %19, %21, %23, %25, %27, %29, %31, %33, %35 in 1 : vector<64x32xbf16>, vector<64x32xbf16>, vector<64x32xbf16>, vector<64x32xbf16>, vector<64x32xbf16>, vector<64x32xbf16>, vector<64x32xbf16>, vector<64x32xbf16>, vector<64x32xbf16> -> vector<64x288xbf16>
    %c0_63 = arith.constant 0 : index
    %c0_64 = arith.constant 0 : index
    %37 = vector.load %arg3[%c0_63, %c0_64] : memref<288x32xbf16, #tpu.memory_space<vmem>>, vector<288x32xbf16>
    %cst_65 = arith.constant dense<0.000000e+00> : vector<64x32xf32>
    %38 = tpu.matmul %36, %37, %cst_65 {dimension_numbers = #tpu.dot_dimension_numbers<[1], [0], [0], [1], [0, 0, 1, 1], [], []>} : vector<64x288xbf16>, vector<288x32xbf16>, vector<64x32xf32> -> vector<64x32xf32>
    %c0_66 = arith.constant 0 : index
    %c0_67 = arith.constant 0 : index
    %39 = vector.load %arg6[%c0_66, %c0_67] : memref<1x32xf32, #tpu.memory_space<vmem>>, vector<1x32xf32>
    %40 = vector.broadcast %39 : vector<1x32xf32> to vector<64x32xf32>
    %41 = arith.addf %38, %40 : vector<64x32xf32>
    %cst_68 = arith.constant 0.000000e+00 : f32
    %42 = vector.broadcast %cst_68 : f32 to vector<64x32xf32>
    %43 = arith.maximumf %41, %42 : vector<64x32xf32>
    %44 = arith.truncf %43 : vector<64x32xf32> to vector<64x32xbf16>
    %c0_69 = arith.constant 0 : index
    %c0_70 = arith.constant 0 : index
    %45 = vector.load %arg4[%c0_69, %c0_70] : memref<32x128xbf16, #tpu.memory_space<vmem>>, vector<32x128xbf16>
    %cst_71 = arith.constant dense<0.000000e+00> : vector<64x128xf32>
    %46 = tpu.matmul %44, %45, %cst_71 {dimension_numbers = #tpu.dot_dimension_numbers<[1], [0], [0], [1], [0, 0, 1, 1], [], []>} : vector<64x32xbf16>, vector<32x128xbf16>, vector<64x128xf32> -> vector<64x128xf32>
    %c0_72 = arith.constant 0 : index
    %c0_73 = arith.constant 0 : index
    %47 = vector.load %arg7[%c0_72, %c0_73] : memref<1x128xf32, #tpu.memory_space<vmem>>, vector<1x128xf32>
    %48 = vector.broadcast %47 : vector<1x128xf32> to vector<64x128xf32>
    %49 = arith.addf %46, %48 : vector<64x128xf32>
    %50 = arith.extf %1 : vector<64x128xbf16> to vector<64x128xf32>
    %51 = arith.addf %49, %50 : vector<64x128xf32>
    %cst_74 = arith.constant 0.000000e+00 : f32
    %52 = vector.broadcast %cst_74 : f32 to vector<64x128xf32>
    %53 = arith.maximumf %51, %52 : vector<64x128xf32>
    %54 = vector.shape_cast %53 : vector<64x128xf32> to vector<1x8x8x128xf32>
    %55 = arith.truncf %54 : vector<1x8x8x128xf32> to vector<1x8x8x128xbf16>
    %c0_75 = arith.constant 0 : index
    %c0_76 = arith.constant 0 : index
    %c0_77 = arith.constant 0 : index
    %c0_78 = arith.constant 0 : index
    %56 = vector.load %arg8[%c0_75, %c0_76, %c0_77, %c0_78] : memref<1x8x8x128xbf16, #tpu.memory_space<vmem>>, vector<1x8x8x128xbf16>
    tpu.vector_store %arg8[%c0_75, %c0_76, %c0_77, %c0_78], %55 {strides = array<i32>} : memref<1x8x8x128xbf16, #tpu.memory_space<vmem>>, vector<1x8x8x128xbf16>,
    return
  }
  func.func @transform_0(%arg0: i32) -> (i32, i32, i32, i32) {
    %c0_i32 = arith.constant 0 : i32
    %c0_i32_0 = arith.constant 0 : i32
    %c0_i32_1 = arith.constant 0 : i32
    %c0_i32_2 = arith.constant 0 : i32
    return %arg0, %c0_i32, %c0_i32_0, %c0_i32_1 : i32, i32, i32, i32
  }
  func.func @transform_1(%arg0: i32) -> (i32, i32) {
    %c0_i32 = arith.constant 0 : i32
    %c0_i32_0 = arith.constant 0 : i32
    %c0_i32_1 = arith.constant 0 : i32
    return %c0_i32, %c0_i32_0 : i32, i32
  }
  func.func @transform_2(%arg0: i32) -> (i32, i32) {
    %c0_i32 = arith.constant 0 : i32
    %c0_i32_0 = arith.constant 0 : i32
    %c0_i32_1 = arith.constant 0 : i32
    return %c0_i32, %c0_i32_0 : i32, i32
  }
  func.func @transform_3(%arg0: i32) -> (i32, i32) {
    %c0_i32 = arith.constant 0 : i32
    %c0_i32_0 = arith.constant 0 : i32
    %c0_i32_1 = arith.constant 0 : i32
    return %c0_i32, %c0_i32_0 : i32, i32
  }
  func.func @transform_4(%arg0: i32) -> (i32, i32) {
    %c0_i32 = arith.constant 0 : i32
    %c0_i32_0 = arith.constant 0 : i32
    %c0_i32_1 = arith.constant 0 : i32
    return %c0_i32, %c0_i32_0 : i32, i32
  }
  func.func @transform_5(%arg0: i32) -> (i32, i32) {
    %c0_i32 = arith.constant 0 : i32
    %c0_i32_0 = arith.constant 0 : i32
    %c0_i32_1 = arith.constant 0 : i32
    return %c0_i32, %c0_i32_0 : i32, i32
  }
  func.func @transform_6(%arg0: i32) -> (i32, i32) {
    %c0_i32 = arith.constant 0 : i32
    %c0_i32_0 = arith.constant 0 : i32
    %c0_i32_1 = arith.constant 0 : i32
    return %c0_i32, %c0_i32_0 : i32, i32
  }
  func.func @transform_7(%arg0: i32) -> (i32, i32, i32, i32) {
    %c0_i32 = arith.constant 0 : i32
    %c0_i32_0 = arith.constant 0 : i32
    %c0_i32_1 = arith.constant 0 : i32
    %c0_i32_2 = arith.constant 0 : i32
    return %arg0, %c0_i32, %c0_i32_0, %c0_i32_1 : i32, i32, i32, i32
  }
}

</mosaic_0001>

<bundles_post_ra>
// kernel: tpu_custom_call.1
= control target key start
LH: loop header
LB: loop body
LE: loop exit
PB: predicated region body
PF: predicated region fallthrough
CT: control target
= control target key end

     0   :  { %12 = vsyncpa [#allocation4], 0  ;;  %s3246_s0 = inlined_call_operand.vmem [shape: bf16[2,8,8,128], index: 0, kind: input, shape index: {}]   ;;  %s3247_s1 = inlined_call_operand.vmem [shape: bf16[128,32], index: 1, kind: input, shape index: {}]   ;;  %s3248_s2 = inlined_call_operand.vmem [shape: bf16[288,32], index: 2, kind: input, shape index: {}]   ;;  %s3249_s3 = inlined_call_operand.vmem [shape: bf16[32,128], index: 3, kind: input, shape index: {}]   ;;  %s3250_s4 = inlined_call_operand.vmem [shape: f32[1,32], index: 4, kind: input, shape index: {}]   ;;  %s3251_s5 = inlined_call_operand.vmem [shape: f32[1,32], index: 5, kind: input, shape index: {}]   ;;  %s3252_s6 = inlined_call_operand.vmem [shape: f32[1,128], index: 6, kind: input, shape index: {}]   ;;  %s3253_s7 = inlined_call_operand.hbm [shape: bf16[2,8,8,128], index: 7, kind: output, shape index: {}]  }
   0x1   :  { %14 = vsyncpa [#allocation4 + $0x1], 0  ;;  %s2485_s24 = smov 0   ;;  %s2487_s25 = smov 0  }
   0x2   :  { %s2489_s26 = smov 0   ;;  %s2491_s27 = smov 0  }
   0x3 LB: > { %s2506_s28 = sadd.s32 4294967295, %s2437_s27   ;;  %s2004_s29 = sadd.s32 4294967294, %s2437_s27   ;;  %s2437_s27 = sphi %s2491_s27, %s3269_s27   ;;  %s2433_s26 = sphi %s2489_s26, %s3268_s26   ;;  %s2429_s25 = sphi %s2487_s25, %s3267_s25   ;;  %s2425_s24 = sphi %s2485_s24, %s3266_s24  }
   0x4   : > { %s2510_s30 = sadd.s32 1, %s2437_s27   ;;  %s179_s8 = sadd.s32 1, %s2433_s26 }
   0x5   : > { %s176_s9 = ssub.s32 %s2437_s27, %s2510_s30  ;;  %p189_p0 = scmp.ne.s32.totalorder %s2433_s26, %s2429_s25 }
   0x6   : > { %p177_p1 = scmp.eq.s32.totalorder %s176_s9, 0  ;;  %p190_p2 = scmp.eq.s32.totalorder %s2506_s28, 1 }
   0x7   : > { %p195_p3 = scmp.ne.s32.totalorder %s2429_s25, %s2425_s24  ;;  %p196_p4 = scmp.eq.s32.totalorder %s2004_s29, 1 }
   0x8   : > { %s2521_s10 = scalar_select %p177_p1, %s2433_s26, %s179_s8  }
   0x9   : > { %p2523_p5 = por %p190_p2, %p189_p0  ;;  %p2527_p6 = por %p196_p4, %p195_p3 }
   0xa   : > { %p2007_p7 = scmp.ge.s32.totalorder %s2437_s27, 1  ;;  %p240_p8 = scmp.lt.s32.totalorder %s2437_s27, 3 }
   0xc   : > { %p241_p9 = pnand %p2007_p7, %p240_p8 }
   0xd   : > { %v2320_v0 = vld [vmem:[%s3247_s1] sm:$0xff] (!%p241_p9)   ;;  %p272_p10 = scmp.lt.s32.totalorder (!%p241_p9), %s2506_s28, 1  ;;  %v2321_v1 = vld [vmem:[%s3247_s1 + $0x8] sm:$0xff] (!%p241_p9)   ;;  %v2322_v2 = vld [vmem:[%s3247_s1 + $0x10] sm:$0xff] (!%p241_p9)   ;;  %vm456_vm0 = vcmask (!%p241_p9), 253952   ;;  %vm454_vm3 = vcmask (!%p241_p9), 257024  }
   0xe   : > { %244 = sbr.rel (%p241_p9) target bundleno = 941 (0x3ad), region = 48  ;;  %2224 = vmatprep.subr.bf16.mxu0 (!%p241_p9), %v2320_v0  ;;  %v2323_v3 = vld [vmem:[%s3247_s1 + $0x18] sm:$0xff] (!%p241_p9)   ;;  %v2324_v5 = vld [vmem:[%s3247_s1 + $0x20] sm:$0xff] (!%p241_p9)   ;;  %v2325_v6 = vld [vmem:[%s3247_s1 + $0x28] sm:$0xff] (!%p241_p9)   ;;  %vm463_vm1 = vsmask.f32 (!%p241_p9), 256 }
   0xf   : > { %2225 = vmatpush3.bf16.msra.mxu0 (!%p241_p9), %v2320_v0  ;;  %v2326_v7 = vld [vmem:[%s3247_s1 + $0x30] sm:$0xff] (!%p241_p9)   ;;  %v2327_v8 = vld [vmem:[%s3247_s1 + $0x38] sm:$0xff] (!%p241_p9)   ;;  %vm489_vm2 = vsmask.f32 (!%p241_p9), 7938  ;;  %vm2568_vm4 = vmand (!%p241_p9), %vm456_vm0, %vm463_vm1  ;;  %v2439_v15 = vmov (!%p241_p9), 0   ;;  %vm832_vm7 = vcmask (!%p241_p9), 1042432  }
  0x10   : > { %2226 = vmatprep.subr.bf16.mxu0 (!%p241_p9), %v2321_v1  ;;  %v471_v13 = vld [vmem:[#allocation2 + $0x18] sm:$0x1] (!%p241_p9)  ;;  %v497_v14 = vld [vmem:[#allocation2 + $0x1c] sm:$0x1] (!%p241_p9)  ;;  %455 = vst.msk [vmem:[#allocation2] sm:$0xf] (!%p241_p9), %vm454_vm3, %v2439_v15  ;;  %vm2577_vm5 = vmand (!%p241_p9), %vm456_vm0, %vm489_vm2 }
  0x11   : > { %457 = vst.msk [vmem:[#allocation2 + $0x4] sm:$0x1] (!%p241_p9), %vm456_vm0, %v2439_v15  ;;  %460 = vst.msk [vmem:[#allocation2 + $0x4c] sm:$0x1] (!%p241_p9), %vm456_vm0, %v2439_v15  ;;  %v472_v16 = vsel (!%p241_p9), %vm2568_vm4, 0, %v471_v13  ;;  %v498_v20 = vsel (!%p241_p9), %vm2577_vm5, 0, %v497_v14 }
  0x12   : > { %459 = vst.msk [vmem:[#allocation2 + $0x48] sm:$0xf] (!%p241_p9), %vm454_vm3, %v2439_v15  ;;  %v465_v18 = vld [vmem:[#allocation2 + $0x8] sm:$0x1] (!%p241_p9)  ;;  %v491_v19 = vld [vmem:[#allocation2 + $0xc] sm:$0x1] (!%p241_p9)  ;;  %vm2597_vm6 = vmand (!%p241_p9), %vm454_vm3, %vm489_vm2 }
  0x13   : > { %2227 = vmatpush3.bf16.msra.mxu0 (!%p241_p9), %v2321_v1  ;;  %473 = vst [vmem:[#allocation2 + $0x18] sm:$0x1] (!%p241_p9), %v472_v16  ;;  %v466_v21 = vsel (!%p241_p9), %vm2568_vm4, 0, %v465_v18  ;;  %v492_v22 = vsel (!%p241_p9), %vm2577_vm5, 0, %v491_v19  ;;  %v474_v23 = vld [vmem:[#allocation2 + $0x20] sm:$0x1] (!%p241_p9) }
  0x14   : > { %2228 = vmatprep.subr.bf16.mxu0 (!%p241_p9), %v2322_v2  ;;  %499 = vst [vmem:[#allocation2 + $0x1c] sm:$0x1] (!%p241_p9), %v498_v20  ;;  %467 = vst [vmem:[#allocation2 + $0x8] sm:$0x1] (!%p241_p9), %v466_v21  ;;  %v475_v24 = vsel (!%p241_p9), %vm2568_vm4, 0, %v474_v23  ;;  %v2620_v48 = vld [vmem:[%s3248_s2 + $0x80] sm:$0xff] (!%p241_p9)  }
  0x15   : > { %s273_s17 = scalar_select %p272_p10, %s2506_s28, 1  ;;  %493 = vst [vmem:[#allocation2 + $0xc] sm:$0x1] %v492_v22  ;;  %v500_v25 = vld [vmem:[#allocation2 + $0x24] sm:$0x1]  ;;  %v2335_v49 = vld [vmem:[%s3248_s2 + $0x88] sm:$0xff]  }
  0x16   : > { %v468_v26 = vld [vmem:[#allocation2 + $0x10] sm:$0x1]  ;;  %476 = vst [vmem:[#allocation2 + $0x20] sm:$0x1] %v475_v24  ;;  %v501_v27 = vsel %vm2577_vm5, 0, %v500_v25  ;;  %v2342_v50 = vld [vmem:[%s3248_s2 + $0x40] sm:$0xff]  }
  0x17   : > { %s2127_s20 = sshll.u32 %s273_s17, 5  ;;  %2229 = vmatpush3.bf16.msra.mxu0 %v2322_v2  ;;  %v469_v28 = vsel %vm2568_vm4, 0, %v468_v26  ;;  %v494_v29 = vld [vmem:[#allocation2 + $0x14] sm:$0x1]  ;;  %502 = vst [vmem:[#allocation2 + $0x24] sm:$0x1] %v501_v27  ;;  %2172 = vmatprep.subr.bf16.mxu1 %v2342_v50 }
  0x18   : > { %s2547_s23 = scalar_lea.vmem %s3246_s0, %s2127_s20  ;;  %2230 = vmatprep.subr.bf16.mxu0 %v2323_v3  ;;  %470 = vst [vmem:[#allocation2 + $0x10] sm:$0x1] %v469_v28  ;;  %v495_v30 = vsel %vm2577_vm5, 0, %v494_v29  ;;  %v483_v32 = vld [vmem:[#allocation2 + $0x38] sm:$0x1]  ;;  %v2343_v51 = vld [vmem:[%s3248_s2] sm:$0xff]  }
  0x19   : > { %v278_v4 = vld [vmem:[%s2547_s23] sm:$0xff]   ;;  %v280_v9 = vld [vmem:[%s2547_s23 + $0x8] sm:$0xff]   ;;  %v282_v10 = vld [vmem:[%s2547_s23 + $0x10] sm:$0xff]   ;;  %496 = vst [vmem:[#allocation2 + $0x14] sm:$0x1] %v495_v30  ;;  %v484_v33 = vsel %vm2568_vm4, 0, %v483_v32  ;;  %2173 = vmatpush3.bf16.msra.mxu1 %v2343_v51 }
  0x1a   : > { %2240 = vmatprep.mubr.bf16.mxu0 %v278_v4  ;;  %v284_v11 = vld [vmem:[%s2547_s23 + $0x18] sm:$0xff]   ;;  %485 = vst [vmem:[#allocation2 + $0x38] sm:$0x1] %v484_v33  ;;  %v477_v35 = vld [vmem:[#allocation2 + $0x28] sm:$0x1]  ;;  %vm833_vm8 = vcmask 1046532  }
  0x1b   : > { %2231 = vmatpush3.bf16.msra.mxu0 %v2323_v3  ;;  %v509_v34 = vld [vmem:[#allocation2 + $0x3c] sm:$0x1]  ;;  %v478_v37 = vsel %vm2568_vm4, 0, %v477_v35  ;;  %v503_v38 = vld [vmem:[#allocation2 + $0x2c] sm:$0x1]  ;;  %vm2653_vm9 = vmor %vm832_vm7, %vm833_vm8  ;;  %s2440_s14 = smov 96  }
  0x1c   : > { %2232 = vmatprep.subr.bf16.mxu0 %v2324_v5  ;;  %v510_v36 = vsel %vm2577_vm5, 0, %v509_v34  ;;  %479 = vst [vmem:[#allocation2 + $0x28] sm:$0x1] %v478_v37  ;;  %v504_v39 = vsel %vm2577_vm5, 0, %v503_v38  ;;  %v486_v40 = vld [vmem:[#allocation2 + $0x40] sm:$0x1] }
  0x1d   : > { %511 = vst [vmem:[#allocation2 + $0x3c] sm:$0x1] %v510_v36  ;;  %505 = vst [vmem:[#allocation2 + $0x2c] sm:$0x1] %v504_v39  ;;  %v512_v41 = vld [vmem:[#allocation2 + $0x44] sm:$0x1] }
  0x1e   : > { %v487_v42 = vsel %vm2568_vm4, 0, %v486_v40  ;;  %v513_v43 = vsel %vm2577_vm5, 0, %v512_v41  ;;  %v480_v44 = vld [vmem:[#allocation2 + $0x30] sm:$0x1]  ;;  %v506_v45 = vld [vmem:[#allocation2 + $0x34] sm:$0x1] }
  0x1f   : > { %2233 = vmatpush3.bf16.msra.mxu0 %v2324_v5  ;;  %488 = vst [vmem:[#allocation2 + $0x40] sm:$0x1] %v487_v42  ;;  %514 = vst [vmem:[#allocation2 + $0x44] sm:$0x1] %v513_v43  ;;  %v481_v46 = vsel %vm2568_vm4, 0, %v480_v44  ;;  %v507_v47 = vsel %vm2577_vm5, 0, %v506_v45 }
  0x20   : > { %2234 = vmatprep.subr.bf16.mxu0 %v2325_v6  ;;  %482 = vst [vmem:[#allocation2 + $0x30] sm:$0x1] %v481_v46  ;;  %508 = vst [vmem:[#allocation2 + $0x34] sm:$0x1] %v507_v47  ;;  %v2344_v52 = vld [vmem:[%s3248_s2 + $0x48] sm:$0xff]   ;;  %vm1416_vm10 = vcmask 261120  }
  0x21   : > { %v2345_v53 = vld [vmem:[%s3248_s2 + $0x8] sm:$0xff]   ;;  %2174 = vmatprep.subr.bf16.mxu1 %v2344_v52  ;;  %v677_v54 = vld [vmem:[#allocation2] sm:$0xf]  ;;  %v2646_v57 = vld [vmem:[#allocation2 + $0x4] sm:$0x1]  ;;  %s2441_s17 = smov 32  }
  0x22   : > { %2175 = vmatpush3.bf16.msra.mxu1 %v2345_v53  ;;  %v2639_v55 = vld [vmem:[#allocation2 + $0x48] sm:$0xf]  ;;  %v2644_v56 = vld [vmem:[%s3250_s4] ss:$0 sm:$0xff]  ;;  %v808_v58 = vld [vmem:[#allocation2] sm:$0xe] }
  0x23   : > { %2235 = vmatpush3.bf16.msra.mxu0 %v2325_v6  ;;  %v697_v59 = vshrl.u32 %v677_v54, 16  ;;  %v700_v60 = vshll.u32 %v677_v54, 16  ;;  %v1167_v61 = vshrl.u32 %v2639_v55, 16  ;;  %v1170_v62 = vshll.u32 %v2639_v55, 16  ;;  %v2674_v24 = vld [vmem:[#allocation2 + $0x4c] sm:$0x1] }
  0x24   : > { %2236 = vmatprep.subr.bf16.mxu0 %v2326_v7  ;;  %v2032_v2 = vrot.slane %v808_v58, 9  ;;  %v837_v3 = vrot.slane %v2646_v57, 5  ;;  %v706_v23 = vshll.u32 %v2646_v57, 16  ;;  %v1176_v28 = vshll.u32 %v2674_v24, 16  ;;  %v641_v30 = vld [vmem:[#allocation2 + $0x18] sm:$0xf] }
  0x25   : > { %v2662_v13 = vrot.slane %v1167_v61, 4  ;;  %v2664_v14 = vrot.slane %v1170_v62, 5  ;;  %v644_v32 = vld [vmem:[#allocation2 + $0x1c] sm:$0x1]  ;;  %v629_v38 = vld [vmem:[#allocation2 + $0x8] sm:$0xf] }
  0x26   : > { %v2669_v19 = vsel %vm2653_vm9, %v2032_v2, %v837_v3  ;;  %v632_v39 = vld [vmem:[#allocation2 + $0xc] sm:$0x1]  ;;  %v647_v45 = vld [vmem:[#allocation2 + $0x20] sm:$0xf]  ;;  %v650_v54 = vld [vmem:[#allocation2 + $0x24] sm:$0x1] }
  0x27   : > { %2237 = vmatpush3.bf16.msra.mxu0 %v2326_v7  ;;  %v2657_v7 = vrot.slane %v697_v59, 4  ;;  %v1173_v27 = vor.u32 %v2664_v14, %v2662_v13  ;;  %v2725_v57 = vrot.slane %v1176_v28, 5  ;;  %vm693_vm11 = vsmask.f32 3328  ;;  %s2442_s20 = smov 64   ;;  %s2443_s21 = smov [#allocation3]  }
  0x28   : > { %2238 = vmatprep.subr.bf16.mxu0 %v2327_v8  ;;  %vm694_vm12 = vsmask.f32 7440  ;;  %vm1429_vm14 = vcmask 523264   ;;  %vm1438_vm15 = vcmask 785408   ;;  %s2379_s22 = sshll.u32 %s2443_s21, 4  ;;  %s2380_s22 = int_to_ptr.vmem [resolvable:$false] %s2379_s22 }
  0x29   : > { %vm2814_vm13 = vmor %vm693_vm11, %vm694_vm12  ;;  %s2381_s29 = scalar_lea.vmem %s2380_s22, 1024 }
  0x2b   : > { %2239 = vmatpush3.bf16.msra.mxu0 %v2327_v8  ;;  %v2659_v8 = vrot.slane %v700_v60, 5 }
  0x2c   : > { %2248 = vmatprep.subr.bf16.mxu0 %v2620_v48 }
  0x2d   : > { %v703_v22 = vor.u32 %v2659_v8, %v2657_v7  ;;  %v2721_v7 = vrot.slane %v1173_v27, 4 }
  0x2e   : > { %2241 = vmatmul.mubr.bf16.vlgmr.msra.gmra.mrb[0].mxu0 %v280_v9 }
  0x2f   : > { %2244 = vmatprep.mubr.bf16.mxu0 %v282_v10  ;;  %2249 = vmatpush3.bf16.msra.mxu0 %v2620_v48 }
  0x30   : > { %2250 = vmatprep.subr.bf16.mxu0 %v2335_v49 }
  0x33   : > { %2251 = vmatpush3.bf16.msra.mxu0 %v2335_v49 }
  0x36   : > { %2245 = vmatmul.mubr.bf16.gmra.mrb[4].mxu0 %v284_v11 }
 0x101   : > { %v2242_v63 = vpop.f32.mrb[0].mxu0 }
 0x102   : > { %v424_v0 = vadd.f32 %v2242_v63, %v2644_v56  ;;  %v415_v1 = vpop.f32.mrb[1].mxu0  ;;  %v635_v63 = vld [vmem:[#allocation2 + $0x10] sm:$0xf] }
 0x103   : > { %v416_v4 = vadd.f32 %v2644_v56, %v415_v1  ;;  %v2243_v5 = vpop.f32.mrb[2].mxu0 }
 0x104   : > { %v448_v9 = vmax.f32 %v424_v0, 0.0  ;;  %v427_v10 = vadd.f32 %v2243_v5, %v2644_v56  ;;  %v418_v11 = vpop.f32.mrb[3].mxu0  ;;  %v638_v5 = vld [vmem:[#allocation2 + $0x14] sm:$0x1] }
 0x105   : > { %v446_v15 = vmax.f32 %v416_v4, 0.0  ;;  %v419_v16 = vadd.f32 %v2644_v56, %v418_v11 }
 0x106   : > { %v2130_v17 = vpack.c.bf16 %v448_v9, %v448_v9  ;;  %v449_v18 = vmax.f32 %v427_v10, 0.0  ;;  %v2346_v9 = vld [vmem:[%s3248_s2 + $0x50] sm:$0xff]  }
 0x107   : > { %v2128_v20 = vpack.c.bf16 %v446_v15, %v446_v15  ;;  %v447_v21 = vmax.f32 %v419_v16, 0.0  ;;  %v2347_v10 = vld [vmem:[%s3248_s2 + $0x10] sm:$0xff]   ;;  %2176 = vmatprep.subr.bf16.mxu1 %v2346_v9 }
 0x108   : > { %v564_v25 = vshrl.u32 %v2130_v17, 16  ;;  %v2131_v26 = vpack.c.bf16 %v449_v18, %v449_v18  ;;  %v567_v29 = vshll.u32 %v2130_v17, 16  ;;  %2177 = vmatpush3.bf16.msra.mxu1 %v2347_v10  ;;  %v662_v9 = vld [vmem:[#allocation2 + $0x34] sm:$0x1] }
 0x109   : > { %v548_v33 = vshrl.u32 %v2128_v20, 16  ;;  %v551_v34 = vshll.u32 %v2128_v20, 16  ;;  %v2129_v35 = vpack.c.bf16 %v447_v21, %v447_v21  ;;  %v2246_v36 = vpop.f32.mrb[4].mxu0 }
 0x10a   : > { %v566_v37 = vrot.slane %v564_v25, 7  ;;  %v572_v40 = vshrl.u32 %v2131_v26, 16  ;;  %v575_v41 = vshll.u32 %v2131_v26, 16  ;;  %v440_v42 = vadd.f32 %v2246_v36, %v2644_v56  ;;  %v431_v43 = vpop.f32.mrb[5].mxu0 }
 0x10b   : > { %v550_v44 = vrot.slane %v548_v33, 7  ;;  %v556_v46 = vshrl.u32 %v2129_v35, 16  ;;  %v559_v47 = vshll.u32 %v2129_v35, 16  ;;  %v432_v49 = vadd.f32 %v2644_v56, %v431_v43  ;;  %v2247_v50 = vpop.f32.mrb[6].mxu0  ;;  %v2705_v33 = vld [vmem:[#allocation2 + $0x48] sm:$0xe] }
 0x10c   : > { %v569_v51 = vor.u32 %v567_v29, %v566_v37  ;;  %v570_v52 = vrot.slane %v566_v37, 4  ;;  %v574_v53 = vrot.slane %v572_v40, 7  ;;  %v452_v58 = vmax.f32 %v440_v42, 0.0  ;;  %v434_v59 = vpop.f32.mrb[7].mxu0 }
 0x10d   : > { %v553_v60 = vor.u32 %v551_v34, %v550_v44  ;;  %v554_v61 = vrot.slane %v550_v44, 4  ;;  %v558_v62 = vrot.slane %v556_v46, 7  ;;  %v450_v0 = vmax.f32 %v432_v49, 0.0  ;;  %v653_v44 = vld [vmem:[#allocation2 + $0x28] sm:$0xf] }
 0x10e   : > { %v642_v1 = vsel %vm2597_vm6, %v569_v51, %v641_v30  ;;  %v645_v2 = vsel %vm2568_vm4, %v570_v52, %v644_v32  ;;  %v577_v3 = vor.u32 %v575_v41, %v574_v53  ;;  %v578_v4 = vrot.slane %v574_v53, 4  ;;  %v656_v49 = vld [vmem:[#allocation2 + $0x2c] sm:$0x1] }
 0x10f   : > { %643 = vst [vmem:[#allocation2 + $0x18] sm:$0xf] %v642_v1  ;;  %646 = vst [vmem:[#allocation2 + $0x1c] sm:$0x1] %v645_v2  ;;  %v630_v11 = vsel %vm2597_vm6, %v553_v60, %v629_v38  ;;  %v633_v15 = vsel %vm2568_vm4, %v554_v61, %v632_v39  ;;  %v561_v16 = vor.u32 %v559_v47, %v558_v62  ;;  %v562_v17 = vrot.slane %v558_v62, 4 }
 0x110   : > { %631 = vst [vmem:[#allocation2 + $0x8] sm:$0xf] %v630_v11  ;;  %634 = vst [vmem:[#allocation2 + $0xc] sm:$0x1] %v633_v15  ;;  %v648_v18 = vsel %vm2597_vm6, %v577_v3, %v647_v45  ;;  %v651_v20 = vsel %vm2568_vm4, %v578_v4, %v650_v54  ;;  %v2134_v21 = vpack.c.bf16 %v452_v58, %v452_v58  ;;  %v665_v38 = vld [vmem:[#allocation2 + $0x38] sm:$0xf] }
 0x111   : > { %v2132_v25 = vpack.c.bf16 %v450_v0, %v450_v0  ;;  %649 = vst [vmem:[#allocation2 + $0x20] sm:$0xf] %v648_v18  ;;  %652 = vst [vmem:[#allocation2 + $0x24] sm:$0x1] %v651_v20  ;;  %v636_v26 = vsel %vm2597_vm6, %v561_v16, %v635_v63  ;;  %v639_v29 = vsel %vm2568_vm4, %v562_v17, %v638_v5  ;;  %v2710_v41 = vrot.slane %v703_v22, 4  ;;  %v2348_v17 = vld [vmem:[%s3248_s2 + $0x58] sm:$0xff]  }
 0x112   : > { %v443_v30 = vadd.f32 %v2247_v50, %v2644_v56  ;;  %v435_v32 = vadd.f32 %v2644_v56, %v434_v59  ;;  %637 = vst [vmem:[#allocation2 + $0x10] sm:$0xf] %v636_v26  ;;  %640 = vst [vmem:[#allocation2 + $0x14] sm:$0x1] %v639_v29  ;;  %v596_v34 = vshrl.u32 %v2134_v21, 16  ;;  %v599_v35 = vshll.u32 %v2134_v21, 16  ;;  %2178 = vmatprep.subr.bf16.mxu1 %v2348_v17 }
 0x113   : > { %v580_v36 = vshrl.u32 %v2132_v25, 16  ;;  %v583_v37 = vshll.u32 %v2132_v25, 16  ;;  %v2714_v56 = vrot.slane %v706_v23, 5  ;;  %v2055_v45 = vrot.slane %v2705_v33, 9  ;;  %v668_v47 = vld [vmem:[#allocation2 + $0x3c] sm:$0x1] }
 0x114   : > { %v453_v39 = vmax.f32 %v443_v30, 0.0  ;;  %v451_v40 = vmax.f32 %v435_v32, 0.0  ;;  %v598_v42 = vrot.slane %v596_v34, 7  ;;  %v1234_v46 = vrot.slane %v2674_v24, 5  ;;  %v671_v62 = vld [vmem:[#allocation2 + $0x40] sm:$0xf] }
 0x115   : > { %v582_v43 = vrot.slane %v580_v36, 7  ;;  %v674_v63 = vld [vmem:[#allocation2 + $0x44] sm:$0x1]  ;;  %v659_v0 = vld [vmem:[#allocation2 + $0x30] sm:$0xf] }
 0x116   : > { %v2135_v50 = vpack.c.bf16 %v453_v39, %v453_v39  ;;  %v2133_v51 = vpack.c.bf16 %v451_v40, %v451_v40  ;;  %v601_v8 = vor.u32 %v599_v35, %v598_v42  ;;  %v602_v22 = vrot.slane %v598_v42, 4  ;;  %v869_v53 = vld [vmem:[#allocation2 + $0x18] sm:$0xf]  ;;  %v2727_v61 = vld [vmem:[#allocation2 + $0x1c] sm:$0x1] }
 0x117   : > { %v585_v23 = vor.u32 %v583_v37, %v582_v43  ;;  %v586_v52 = vrot.slane %v582_v43, 4  ;;  %v912_v4 = vshrl.u32 %v869_v53, 16  ;;  %v915_v5 = vshll.u32 %v869_v53, 16  ;;  %v997_v29 = vld [vmem:[#allocation2 + $0x18] sm:$0xe] }
 0x118   : > { %v604_v54 = vshrl.u32 %v2135_v50, 16  ;;  %v607_v58 = vshll.u32 %v2135_v50, 16  ;;  %v588_v59 = vshrl.u32 %v2133_v51, 16  ;;  %v591_v60 = vshll.u32 %v2133_v51, 16  ;;  %v870_v1 = vld [vmem:[#allocation2 + $0x20] sm:$0xf] }
 0x119   : > { %v666_v13 = vsel %vm2597_vm6, %v601_v8, %v665_v38  ;;  %v669_v14 = vsel %vm2568_vm4, %v602_v22, %v668_v47  ;;  %v654_v27 = vsel %vm2597_vm6, %v585_v23, %v653_v44  ;;  %v657_v28 = vsel %vm2568_vm4, %v586_v52, %v656_v49  ;;  %v878_v26 = vld [vmem:[#allocation2 + $0x24] sm:$0x1]  ;;  %v998_v36 = vld [vmem:[#allocation2 + $0x20] sm:$0xe]  ;;  %v2750_v42 = vld [vmem:[#allocation2 + $0x14] sm:$0x1] }
 0x11a   : > { %667 = vst [vmem:[#allocation2 + $0x38] sm:$0xf] %v666_v13  ;;  %670 = vst [vmem:[#allocation2 + $0x3c] sm:$0x1] %v669_v14  ;;  %v606_v2 = vrot.slane %v604_v54, 7  ;;  %v590_v3 = vrot.slane %v588_v59, 7  ;;  %v2069_v10 = vcombine.low %v869_v53, %v870_v1 }
 0x11b   : > { %655 = vst [vmem:[#allocation2 + $0x28] sm:$0xf] %v654_v27  ;;  %658 = vst [vmem:[#allocation2 + $0x2c] sm:$0x1] %v657_v28  ;;  %v926_v11 = vshrl.u32 %v870_v1, 16  ;;  %v929_v15 = vshll.u32 %v870_v1, 16 }
 0x11c   : > { %v921_v16 = vshll.u32 %v2727_v61, 16  ;;  %v609_v18 = vor.u32 %v607_v58, %v606_v2  ;;  %v610_v20 = vrot.slane %v606_v2, 4  ;;  %v593_v21 = vor.u32 %v591_v60, %v590_v3  ;;  %1318 = vrot.lane.b32.xlu1 %v2069_v10, %s2440_s14  ;;  %v1180_v43 = vld [vmem:[#allocation2 + $0x10] sm:$0xe]  ;;  %v2754_v51 = vld [vmem:[#allocation2 + $0x1c] sm:$0x1] }
 0x11d   : > { %v594_v25 = vrot.slane %v590_v3, 4  ;;  %v914_v30 = vrot.slane %v912_v4, 4  ;;  %v917_v32 = vrot.slane %v915_v5, 5  ;;  %v928_v34 = vrot.slane %v926_v11, 4  ;;  %v1181_v31 = vld [vmem:[#allocation2 + $0x18] sm:$0xe] }
 0x11e   : > { %v931_v35 = vrot.slane %v929_v15, 5  ;;  %v672_v37 = vsel %vm2597_vm6, %v609_v18, %v671_v62  ;;  %v675_v38 = vsel %vm2568_vm4, %v610_v20, %v674_v63  ;;  %v660_v39 = vsel %vm2597_vm6, %v593_v21, %v659_v0  ;;  %v1053_v52 = vld [vmem:[#allocation2 + $0x18] sm:$0xf]  ;;  %v1052_v60 = vld [vmem:[#allocation2 + $0x10] sm:$0xf] }
 0x11f   : > { %v663_v40 = vsel %vm2568_vm4, %v594_v25, %v662_v9  ;;  %673 = vst [vmem:[#allocation2 + $0x40] sm:$0xf] %v672_v37  ;;  %676 = vst [vmem:[#allocation2 + $0x44] sm:$0x1] %v675_v38  ;;  %v918_v44 = vor.u32 %v917_v32, %v914_v30  ;;  %v2752_v49 = vrot.slane %v921_v16, 5  ;;  %v935_v50 = vshll.u32 %v878_v26, 16 }
 0x120   : > { %661 = vst [vmem:[#allocation2 + $0x30] sm:$0xf] %v660_v39  ;;  %664 = vst [vmem:[#allocation2 + $0x34] sm:$0x1] %v663_v40  ;;  %v932_v47 = vor.u32 %v931_v35, %v928_v34  ;;  %v2042_v8 = vrot.slane %v997_v29, 9  ;;  %v1029_v12 = vrot.slane %v2727_v61, 5  ;;  %v2080_v9 = vcombine.low %v1052_v60, %v1053_v52 }
 0x121   : > { %v2043_v22 = vrot.slane %v998_v36, 9  ;;  %v1033_v23 = vrot.slane %v878_v26, 5  ;;  %v2757_v53 = vrot.slane %v918_v44, 4  ;;  %v2761_v58 = vrot.slane %v935_v50, 5  ;;  %v2768_v28 = vld [vmem:[#allocation2 + $0xc] sm:$0x1] }
 0x122   : > { %v2759_v54 = vrot.slane %v932_v47, 4  ;;  %v2048_v59 = vrot.slane %v1180_v43, 9  ;;  %v1030_v13 = vsel %vm2653_vm9, %v2042_v8, %v1029_v12  ;;  %v1206_v27 = vrot.slane %v2750_v42, 5  ;;  %v2770_v62 = vld [vmem:[#allocation2 + $0x14] sm:$0x1]  ;;  %v2349_v4 = vld [vmem:[%s3248_s2 + $0x18] sm:$0xff]   ;;  %1376 = vrot.lane.b32.xlu1 %v2080_v9, %s2442_s20 }
 0x123   : > { %v1034_v14 = vsel %vm2653_vm9, %v2043_v22, %v1033_v23  ;;  %v2049_v61 = vrot.slane %v1181_v31, 9  ;;  %v1210_v0 = vrot.slane %v2754_v51, 5  ;;  %v1083_v1 = vshrl.u32 %v1053_v52, 16  ;;  %v995_v3 = vld [vmem:[#allocation2 + $0x8] sm:$0xe]  ;;  %2179 = vmatpush3.bf16.msra.mxu1 %v2349_v4  ;;  %v2350_v26 = vld [vmem:[%s3248_s2 + $0x60] sm:$0xff]  }
 0x124   : > { %v2077_v63 = vcombine.low %v1030_v13, %v1034_v14  ;;  %v1086_v2 = vshll.u32 %v1053_v52, 16  ;;  %v1207_v5 = vsel %vm2653_vm9, %v2048_v59, %v1206_v27  ;;  %v1069_v10 = vshrl.u32 %v1052_v60, 16  ;;  %v996_v15 = vld [vmem:[#allocation2 + $0x10] sm:$0xe]  ;;  %v867_v16 = vld [vmem:[#allocation2 + $0x8] sm:$0xf]  ;;  %2180 = vmatprep.subr.bf16.mxu1 %v2350_v26 }
 0x125   : > { %v1072_v11 = vshll.u32 %v1052_v60, 16  ;;  %v1211_v17 = vsel %vm2653_vm9, %v2049_v61, %v1210_v0  ;;  %v2781_v18 = vrot.slane %v1083_v1, 4  ;;  %v893_v21 = vshll.u32 %v2768_v28, 16  ;;  %v868_v25 = vld [vmem:[#allocation2 + $0x10] sm:$0xf]  ;;  %v2351_v37 = vld [vmem:[%s3248_s2 + $0x20] sm:$0xff]  }
 0x126   : > { %1350 = vrot.lane.b32.xlu0 %v2077_v63, %s2441_s17  ;;  %v2783_v20 = vrot.slane %v1086_v2, 5  ;;  %v2088_v29 = vcombine.low %v1207_v5, %v1211_v17  ;;  %v2790_v30 = vrot.slane %v1069_v10, 4  ;;  %v907_v34 = vshll.u32 %v2770_v62, 16  ;;  %v2795_v35 = vld [vmem:[#allocation2 + $0x24] sm:$0x1]  ;;  %v2352_v22 = vld [vmem:[%s3248_s2 + $0x68] sm:$0xff]  }
 0x127   : > { %v2792_v32 = vrot.slane %v1072_v11, 5  ;;  %v1182_v36 = vld [vmem:[#allocation2 + $0x20] sm:$0xe]  ;;  %v2040_v38 = vrot.slane %v995_v3, 9  ;;  %v1021_v39 = vrot.slane %v2768_v28, 5  ;;  %v2041_v40 = vrot.slane %v996_v15, 9  ;;  %2181 = vmatpush3.bf16.msra.mxu1 %v2351_v37 }
 0x128   : > { %v1025_v43 = vrot.slane %v2770_v62, 5  ;;  %v2802_v44 = vld [vmem:[#allocation2 + $0x2c] sm:$0x1]  ;;  %2252 = vmatprep.mubr.msk.bf16.mxu0 %vm1416_vm10, %v2088_v29  ;;  %v898_v47 = vshrl.u32 %v868_v25, 16  ;;  %v901_v50 = vshll.u32 %v868_v25, 16  ;;  %v2068_v31 = vcombine.low %v867_v16, %v868_v25  ;;  %2182 = vmatprep.subr.bf16.mxu1 %v2352_v22 }
 0x129   : > { %v884_v8 = vshrl.u32 %v867_v16, 16  ;;  %v1183_v12 = vld [vmem:[#allocation2 + $0x28] sm:$0xe]  ;;  %v1022_v23 = vsel %vm2653_vm9, %v2040_v38, %v1021_v39  ;;  %v887_v59 = vshll.u32 %v867_v16, 16  ;;  %v2050_v60 = vrot.slane %v1182_v36, 9 }
 0x12a   : > { %v1026_v52 = vsel %vm2653_vm9, %v2041_v40, %v1025_v43  ;;  %v1054_v13 = vld [vmem:[#allocation2 + $0x20] sm:$0xf]  ;;  %v900_v61 = vrot.slane %v898_v47, 4  ;;  %v903_v63 = vrot.slane %v901_v50, 5  ;;  %1316 = vrot.lane.b32.xlu1 %v2068_v31, %s2440_s14  ;;  %v2353_v1 = vld [vmem:[%s3248_s2 + $0x28] sm:$0xff]   ;;  %v1214_v3 = vrot.slane %v2795_v35, 5 }
 0x12b   : > { %v2076_v27 = vcombine.low %v1022_v23, %v1026_v52  ;;  %v886_v0 = vrot.slane %v884_v8, 4  ;;  %v889_v2 = vrot.slane %v887_v59, 5  ;;  %v2051_v4 = vrot.slane %v1183_v12, 9  ;;  %v1055_v9 = vld [vmem:[#allocation2 + $0x28] sm:$0xf]  ;;  %2183 = vmatpush3.bf16.msra.mxu1 %v2353_v1  ;;  %v2355_v12 = vld [vmem:[%s3248_s2 + $0x70] sm:$0xff]  }
 0x12c   : > { %v1218_v5 = vrot.slane %v2802_v44, 5  ;;  %v904_v10 = vor.u32 %v903_v63, %v900_v61  ;;  %v1097_v11 = vshrl.u32 %v1054_v13, 16  ;;  %v1100_v15 = vshll.u32 %v1054_v13, 16  ;;  %v686_v16 = vld [vmem:[#allocation2 + $0xc] sm:$0x1]  ;;  %2184 = vmatprep.subr.bf16.mxu1 %v2355_v12 }
 0x12d   : > { %1348 = vrot.lane.b32.xlu0 %v2076_v27, %s2441_s17  ;;  %v809_v17 = vld [vmem:[#allocation2 + $0x8] sm:$0xe]  ;;  %v709_v25 = vsel %vm2814_vm13, %v2710_v41, %v2714_v56  ;;  %v1215_v26 = vsel %vm2653_vm9, %v2050_v60, %v1214_v3  ;;  %v2835_v37 = vld [vmem:[#allocation2 + $0x14] sm:$0x1]  ;;  %v810_v38 = vld [vmem:[#allocation2 + $0x10] sm:$0xe]  ;;  %v1179_v39 = vsel %vm2814_vm13, %v2721_v7, %v2725_v57  ;;  %v2847_v40 = vsel %vm2653_vm9, %v2055_v45, %v1234_v46 }
 0x12e   : > { %v1219_v29 = vsel %vm2653_vm9, %v2051_v4, %v1218_v5  ;;  %v2833_v36 = vld [vmem:[#allocation2 + $0x8] sm:$0xf]  ;;  %v890_v43 = vor.u32 %v889_v2, %v886_v0  ;;  %v1111_v50 = vshrl.u32 %v1055_v9, 16  ;;  %v1114_v31 = vshll.u32 %v1055_v9, 16  ;;  %v811_v8 = vld [vmem:[#allocation2 + $0x18] sm:$0xe] }
 0x12f   : > { %v2089_v47 = vcombine.low %v1215_v26, %v1219_v29  ;;  %v2852_v22 = vrot.slane %v904_v10, 4  ;;  %v2854_v23 = vrot.slane %v1097_v11, 4  ;;  %v2856_v24 = vrot.slane %v1100_v15, 5  ;;  %v2858_v52 = vld [vmem:[#allocation2 + $0x1c] sm:$0x1]  ;;  %v2356_v45 = vld [vmem:[%s3248_s2 + $0x30] sm:$0xff]  }
 0x130   : > { %v2081_v33 = vcombine.low %v1054_v13, %v1055_v9  ;;  %v2033_v46 = vrot.slane %v809_v17, 9  ;;  %v841_v59 = vrot.slane %v686_v16, 5  ;;  %v711_v60 = vshrl.u32 %v2833_v36, 16  ;;  %v2866_v61 = vld [vmem:[#allocation2 + $0x30] sm:$0xf]  ;;  %2185 = vmatpush3.bf16.msra.mxu1 %v2356_v45  ;;  %v2357_v10 = vld [vmem:[%s3248_s2 + $0x78] sm:$0xff]  }
 0x131   : > { %2253 = vmatmul.mubr.msk.bf16.vlgmr.msra.gmra.mrb[8].mxu0 %vm1416_vm10, %v2089_v47  ;;  %v714_v27 = vshll.u32 %v2833_v36, 16  ;;  %v720_v13 = vshll.u32 %v686_v16, 16  ;;  %v2034_v63 = vrot.slane %v810_v38, 9  ;;  %v845_v0 = vrot.slane %v2835_v37, 5  ;;  %v2873_v9 = vld [vmem:[#allocation2 + $0x38] sm:$0xf]  ;;  %2186 = vmatprep.subr.bf16.mxu1 %v2357_v10 }
 0x132   : > { %1378 = vrot.lane.b32.xlu0 %v2081_v33, %s2442_s20  ;;  %v2035_v1 = vrot.slane %v811_v8, 9  ;;  %v842_v2 = vsel %vm2653_vm9, %v2033_v46, %v841_v59  ;;  %v713_v3 = vrot.slane %v711_v60, 4  ;;  %v849_v5 = vrot.slane %v2858_v52, 5  ;;  %v871_v26 = vld [vmem:[#allocation2 + $0x28] sm:$0xf] }
 0x133   : > { %v716_v4 = vrot.slane %v714_v27, 5  ;;  %v2878_v11 = vrot.slane %v890_v43, 4  ;;  %v2064_v15 = vcombine.low %v2669_v19, %v842_v2  ;;  %v846_v16 = vsel %vm2653_vm9, %v2034_v63, %v845_v0  ;;  %v872_v12 = vld [vmem:[#allocation2 + $0x30] sm:$0xf]  ;;  %v2918_v41 = vld [vmem:[#allocation2 + $0x18] sm:$0xf] }
 0x134   : > { %v1125_v17 = vshrl.u32 %v2866_v61, 16  ;;  %v2884_v29 = vrot.slane %v1111_v50, 4  ;;  %v2886_v38 = vrot.slane %v1114_v31, 5  ;;  %v850_v8 = vsel %vm2653_vm9, %v2035_v1, %v849_v5  ;;  %v2358_v5 = vld [vmem:[%s3248_s2 + $0x38] sm:$0xff]  }
 0x135   : > { %v717_v47 = vor.u32 %v716_v4, %v713_v3  ;;  %1288 = vrot.lane.b32.xlu1 %v2064_v15, %s2442_s20  ;;  %v722_v43 = vrot.slane %v720_v13, 5  ;;  %v2065_v19 = vcombine.low %v846_v16, %v850_v8  ;;  %v1128_v33 = vshll.u32 %v2866_v61, 16  ;;  %v2902_v4 = vld [vmem:[#allocation2 + $0x10] sm:$0xf]  ;;  %2187 = vmatpush3.bf16.msra.mxu1 %v2358_v5  ;;  %v1185_v62 = vld [vmem:[#allocation2 + $0x38] sm:$0xe] }
 0x136   : > { %v1139_v45 = vshrl.u32 %v2873_v9, 16  ;;  %v2893_v59 = vrot.slane %v1125_v17, 4  ;;  %v1142_v50 = vshll.u32 %v2873_v9, 16  ;;  %v940_v31 = vshrl.u32 %v871_v26, 16  ;;  %2272 = vmatprep.subr.bf16.mxu1 %v2620_v48  ;;  %v1000_v48 = vld [vmem:[#allocation2 + $0x30] sm:$0xe] }
 0x137   : > { %v718_v46 = vrot.slane %v717_v47, 4  ;;  %v2082_v60 = vcombine.low %v2866_v61, %v2873_v9  ;;  %v943_v27 = vshll.u32 %v871_v26, 16  ;;  %v954_v63 = vshrl.u32 %v872_v12, 16 }
 0x138   : > { %v957_v0 = vshll.u32 %v872_v12, 16  ;;  %v942_v1 = vrot.slane %v940_v31, 4  ;;  %v2070_v2 = vcombine.low %v871_v26, %v872_v12  ;;  %v1075_v3 = vor.u32 %v2792_v32, %v2790_v30 }
 0x139   : > { %v723_v13 = vsel %vm2814_vm13, %v718_v46, %v722_v43  ;;  %1290 = vrot.lane.b32.xlu1 %v2065_v19, %s2442_s20  ;;  %v945_v9 = vrot.slane %v943_v27, 5  ;;  %v956_v10 = vrot.slane %v954_v63, 4  ;;  %v1078_v30 = vshll.u32 %v2750_v42, 16  ;;  %v2933_v27 = vld [vmem:[#allocation2 + $0x34] sm:$0x1] }
 0x13a   : > { %v2060_v61 = vcombine.low %v709_v25, %v723_v13  ;;  %v959_v15 = vrot.slane %v957_v0, 5  ;;  %v1076_v16 = vrot.slane %v1075_v3, 4  ;;  %v1089_v32 = vor.u32 %v2783_v20, %v2781_v18  ;;  %v999_v20 = vld [vmem:[#allocation2 + $0x28] sm:$0xe]  ;;  %v2940_v13 = vld [vmem:[#allocation2 + $0x24] sm:$0x1] }
 0x13b   : > { %v1092_v17 = vshll.u32 %v2754_v51, 16  ;;  %v946_v26 = vor.u32 %v945_v9, %v942_v1  ;;  %v725_v56 = vshrl.u32 %v2902_v4, 16  ;;  %v728_v25 = vshll.u32 %v2902_v4, 16  ;;  %v2926_v51 = vld [vmem:[#allocation2 + $0x2c] sm:$0x1] }
 0x13c   : > { %1268 = vrot.lane.b32.xlu0 %v2060_v61, %s2441_s17  ;;  %v960_v47 = vor.u32 %v959_v15, %v956_v10  ;;  %v2923_v8 = vrot.slane %v1128_v33, 5  ;;  %v1080_v42 = vrot.slane %v1078_v30, 5  ;;  %v1090_v12 = vrot.slane %v1089_v32, 4  ;;  %v812_v3 = vld [vmem:[#allocation2 + $0x20] sm:$0xe] }
 0x13d   : > { %v734_v18 = vshll.u32 %v2835_v37, 16  ;;  %v2928_v43 = vrot.slane %v1139_v45, 4  ;;  %v2930_v19 = vrot.slane %v1142_v50, 5  ;;  %1320 = vrot.lane.b32.xlu1 %v2070_v2, %s2440_s14  ;;  %v727_v46 = vrot.slane %v725_v56, 4  ;;  %v813_v15 = vld [vmem:[#allocation2 + $0x28] sm:$0xe] }
 0x13e   : > { %v730_v31 = vrot.slane %v728_v25, 5  ;;  %v2935_v33 = vrot.slane %v946_v26, 4  ;;  %v1081_v63 = vsel %vm2814_vm13, %v1076_v16, %v1080_v42  ;;  %v1094_v37 = vrot.slane %v1092_v17, 5  ;;  %v690_v17 = vld [vmem:[#allocation2 + $0x2c] sm:$0x1] }
 0x13f   : > { %v739_v0 = vshrl.u32 %v2918_v41, 16  ;;  %v2943_v45 = vrot.slane %v960_v47, 4  ;;  %v742_v1 = vshll.u32 %v2918_v41, 16  ;;  %v748_v2 = vshll.u32 %v2858_v52, 16 }
 0x140   : > { %1380 = vrot.lane.b32.xlu0 %v2082_v60, %s2442_s20  ;;  %v731_v50 = vor.u32 %v730_v31, %v727_v46  ;;  %v1095_v5 = vsel %vm2814_vm13, %v1090_v12, %v1094_v37  ;;  %v736_v61 = vrot.slane %v734_v18, 5  ;;  %v2044_v10 = vrot.slane %v999_v20, 9  ;;  %v2955_v20 = vld [vmem:[#allocation2 + $0x20] sm:$0xf] }
 0x141   : > { %v741_v9 = vrot.slane %v739_v0, 4  ;;  %v2084_v16 = vcombine.low %v1081_v63, %v1095_v5  ;;  %v744_v32 = vrot.slane %v742_v1, 5  ;;  %v1037_v60 = vrot.slane %v2926_v51, 5 }
 0x142   : > { %v732_v30 = vrot.slane %v731_v50, 4  ;;  %v750_v26 = vrot.slane %v748_v2, 5  ;;  %v2045_v47 = vrot.slane %v1000_v48, 9  ;;  %v1041_v56 = vrot.slane %v2933_v27, 5 }
 0x143   : > { %v2036_v25 = vrot.slane %v812_v3, 9  ;;  %v745_v52 = vor.u32 %v744_v32, %v741_v9  ;;  %v1038_v42 = vsel %vm2653_vm9, %v2044_v10, %v1037_v60  ;;  %v853_v12 = vrot.slane %v2940_v13, 5 }
 0x144   : > { %1396 = vrot.lane.b32.xlu0 %v2084_v16, %s2440_s14  ;;  %v2037_v18 = vrot.slane %v813_v15, 9  ;;  %v737_v46 = vsel %vm2814_vm13, %v732_v30, %v736_v61  ;;  %v1042_v31 = vsel %vm2653_vm9, %v2045_v47, %v1041_v56  ;;  %v857_v48 = vrot.slane %v690_v17, 5  ;;  %v2968_v61 = vld [vmem:[#allocation2 + $0x28] sm:$0xf]  ;;  %v2979_v30 = vld [vmem:[#allocation2 + $0x44] sm:$0x1] }
 0x145   : > { %v1103_v63 = vor.u32 %v2856_v24, %v2854_v23  ;;  %v746_v37 = vrot.slane %v745_v52, 4  ;;  %v2078_v0 = vcombine.low %v1038_v42, %v1042_v31  ;;  %v1106_v50 = vshll.u32 %v2795_v35, 16  ;;  %v1001_v56 = vld [vmem:[#allocation2 + $0x38] sm:$0xe]  ;;  %v1002_v31 = vld [vmem:[#allocation2 + $0x40] sm:$0xe] }
 0x146   : > { %v1117_v1 = vor.u32 %v2886_v38, %v2884_v29  ;;  %v949_v2 = vshll.u32 %v2926_v51, 16  ;;  %v1120_v5 = vshll.u32 %v2802_v44, 16  ;;  %v753_v9 = vshrl.u32 %v2955_v20, 16  ;;  %v2977_v44 = vld [vmem:[#allocation2 + $0x3c] sm:$0x1] }
 0x147   : > { %v1104_v3 = vrot.slane %v1103_v63, 4  ;;  %v751_v10 = vsel %vm2814_vm13, %v746_v37, %v750_v26  ;;  %v858_v35 = vsel %vm2653_vm9, %v2037_v18, %v857_v48  ;;  %v1108_v23 = vrot.slane %v1106_v50, 5  ;;  %v691_v48 = vld [vmem:[#allocation2 + $0x34] sm:$0x1]  ;;  %v814_v37 = vld [vmem:[#allocation2 + $0x30] sm:$0xe] }
 0x148   : > { %1352 = vrot.lane.b32.xlu0 %v2078_v0, %s2441_s17  ;;  %v1118_v24 = vrot.slane %v1117_v1, 4  ;;  %v2061_v29 = vcombine.low %v737_v46, %v751_v10  ;;  %v1122_v38 = vrot.slane %v1120_v5, 5  ;;  %v755_v15 = vrot.slane %v753_v9, 4  ;;  %v815_v0 = vld [vmem:[#allocation2 + $0x38] sm:$0xe] }
 0x149   : > { %v756_v16 = vshll.u32 %v2955_v20, 16  ;;  %v854_v32 = vsel %vm2653_vm9, %v2036_v25, %v853_v12  ;;  %v762_v60 = vshll.u32 %v2940_v13, 16  ;;  %v767_v26 = vshrl.u32 %v2968_v61, 16  ;;  %v692_v10 = vld [vmem:[#allocation2 + $0x3c] sm:$0x1] }
 0x14a   : > { %v770_v47 = vshll.u32 %v2968_v61, 16  ;;  %1270 = vrot.lane.b32.xlu1 %v2061_v29, %s2441_s17  ;;  %v1109_v52 = vsel %vm2814_vm13, %v1104_v3, %v1108_v23  ;;  %v1123_v42 = vsel %vm2814_vm13, %v1118_v24, %v1122_v38  ;;  %v776_v46 = vshll.u32 %v690_v17, 16 }
 0x14b   : > { %v758_v18 = vrot.slane %v756_v16, 5  ;;  %v2066_v25 = vcombine.low %v854_v32, %v858_v35  ;;  %v2085_v12 = vcombine.low %v1109_v52, %v1123_v42  ;;  %v769_v13 = vrot.slane %v767_v26, 4  ;;  %v2995_v32 = vld [vmem:[#allocation2 + $0x34] sm:$0x1] }
 0x14c   : > { %v772_v63 = vrot.slane %v770_v47, 5  ;;  %v764_v1 = vrot.slane %v762_v60, 5  ;;  %v778_v5 = vrot.slane %v776_v46, 5  ;;  %v2046_v9 = vrot.slane %v1001_v56, 9 }
 0x14d   : > { %v759_v50 = vor.u32 %v758_v18, %v755_v15  ;;  %1398 = vrot.lane.b32.xlu0 %v2085_v12, %s2440_s14  ;;  %v1045_v23 = vrot.slane %v2977_v44, 5  ;;  %v2047_v24 = vrot.slane %v1002_v31, 9  ;;  %v1049_v17 = vrot.slane %v2979_v30, 5 }
 0x14e   : > { %v773_v3 = vor.u32 %v772_v63, %v769_v13  ;;  %1292 = vrot.lane.b32.xlu1 %v2066_v25, %s2442_s20  ;;  %v2038_v29 = vrot.slane %v814_v37, 9  ;;  %v861_v38 = vrot.slane %v691_v48, 5  ;;  %v2039_v16 = vrot.slane %v815_v0, 9  ;;  %v3011_v25 = vld [vmem:[#allocation2 + $0x3c] sm:$0x1] }
 0x14f   : > { %v760_v35 = vrot.slane %v759_v50, 4  ;;  %v1046_v60 = vsel %vm2653_vm9, %v2046_v9, %v1045_v23  ;;  %v1050_v26 = vsel %vm2653_vm9, %v2047_v24, %v1049_v17  ;;  %v865_v47 = vrot.slane %v692_v10, 5  ;;  %v3016_v63 = vld [vmem:[#allocation2 + $0x30] sm:$0xf]  ;;  %v3021_v50 = vld [vmem:[#allocation2 + $0x38] sm:$0xf] }
 0x150   : > { %v774_v15 = vrot.slane %v773_v3, 4  ;;  %v2079_v52 = vcombine.low %v1046_v60, %v1050_v26  ;;  %v862_v42 = vsel %vm2653_vm9, %v2038_v29, %v861_v38  ;;  %v1131_v18 = vor.u32 %v2923_v8, %v2893_v59  ;;  %v1058_v17 = vld [vmem:[#allocation2 + $0x40] sm:$0xf] }
 0x151   : > { %v765_v56 = vsel %vm2814_vm13, %v760_v35, %v764_v1  ;;  %v866_v31 = vsel %vm2653_vm9, %v2039_v16, %v865_v47  ;;  %v1134_v12 = vshll.u32 %v2995_v32, 16  ;;  %v1145_v13 = vor.u32 %v2930_v19, %v2928_v43 }
 0x152   : > { %v779_v46 = vsel %vm2814_vm13, %v774_v15, %v778_v5  ;;  %v963_v37 = vshll.u32 %v2933_v27, 16  ;;  %1354 = vrot.lane.b32.xlu0 %v2079_v52, %s2441_s17  ;;  %v1132_v59 = vrot.slane %v1131_v18, 4  ;;  %v1148_v8 = vshll.u32 %v3011_v25, 16  ;;  %v3031_v15 = vld [vmem:[#allocation2 + $0x38] sm:$0xf] }
 0x153   : > { %v2062_v0 = vcombine.low %v765_v56, %v779_v46  ;;  %v977_v1 = vshll.u32 %v2977_v44, 16  ;;  %v2067_v5 = vcombine.low %v862_v42, %v866_v31  ;;  %v1136_v9 = vrot.slane %v1134_v12, 5  ;;  %v874_v52 = vld [vmem:[#allocation2 + $0x40] sm:$0xf] }
 0x154   : > { %v1146_v3 = vrot.slane %v1145_v13, 4  ;;  %v1150_v43 = vrot.slane %v1148_v8, 5  ;;  %v781_v19 = vshrl.u32 %v3016_v63, 16  ;;  %v784_v23 = vshll.u32 %v3016_v63, 16 }
 0x155   : > { %1272 = vrot.lane.b32.xlu1 %v2062_v0, %s2441_s17  ;;  %v790_v24 = vshll.u32 %v691_v48, 16  ;;  %v1137_v35 = vsel %vm2814_vm13, %v1132_v59, %v1136_v9  ;;  %v795_v29 = vshrl.u32 %v3021_v50, 16  ;;  %v798_v38 = vshll.u32 %v3021_v50, 16 }
 0x156   : > { %v804_v16 = vshll.u32 %v692_v10, 16  ;;  %v1151_v60 = vsel %vm2814_vm13, %v1146_v3, %v1150_v43  ;;  %v783_v26 = vrot.slane %v781_v19, 4  ;;  %v786_v47 = vrot.slane %v784_v23, 5 }
 0x157   : > { %v792_v56 = vrot.slane %v790_v24, 5  ;;  %v2086_v42 = vcombine.low %v1137_v35, %v1151_v60  ;;  %v797_v48 = vrot.slane %v795_v29, 4  ;;  %v800_v18 = vrot.slane %v798_v38, 5  ;;  %v1186_v24 = vld [vmem:[#allocation2 + $0x40] sm:$0xe] }
 0x158   : > { %v806_v46 = vrot.slane %v804_v16, 5  ;;  %v787_v31 = vor.u32 %v786_v47, %v783_v26  ;;  %v1153_v12 = vshrl.u32 %v1058_v17, 16  ;;  %v1156_v13 = vshll.u32 %v1058_v17, 16  ;;  %v1066_v16 = vld [vmem:[#allocation2 + $0x44] sm:$0x1] }
 0x159   : > { %1294 = vrot.lane.b32.xlu1 %v2067_v5, %s2442_s20  ;;  %v2083_v10 = vcombine.low %v1058_v17, %v2639_v55  ;;  %1400 = vrot.lane.b32.xlu0 %v2086_v42, %s2440_s14  ;;  %v801_v0 = vor.u32 %v800_v18, %v797_v48  ;;  %v968_v59 = vshrl.u32 %v3031_v15, 16  ;;  %v971_v8 = vshll.u32 %v3031_v15, 16 }
 0x15a   : > { %v982_v9 = vshrl.u32 %v874_v52, 16  ;;  %v788_v3 = vrot.slane %v787_v31, 4  ;;  %v1155_v43 = vrot.slane %v1153_v12, 4  ;;  %v1158_v19 = vrot.slane %v1156_v13, 5 }
 0x15b   : > { %v985_v23 = vshll.u32 %v874_v52, 16  ;;  %v802_v35 = vrot.slane %v801_v0, 4  ;;  %v970_v5 = vrot.slane %v968_v59, 4  ;;  %v973_v29 = vrot.slane %v971_v8, 5 }
 0x15c   : > { %v984_v38 = vrot.slane %v982_v9, 4  ;;  %v991_v55 = vshll.u32 %v2979_v30, 16  ;;  %v793_v17 = vsel %vm2814_vm13, %v788_v3, %v792_v56  ;;  %v1159_v26 = vor.u32 %v1158_v19, %v1155_v43 }
 0x15d   : > { %v987_v60 = vrot.slane %v985_v23, 5  ;;  %v807_v47 = vsel %vm2814_vm13, %v802_v35, %v806_v46  ;;  %1382 = vrot.lane.b32.xlu0 %v2083_v10, %s2442_s20  ;;  %v974_v42 = vor.u32 %v973_v29, %v970_v5  ;;  %v1162_v48 = vshll.u32 %v1066_v16, 16 }
 0x15e   : > { %v2054_v18 = vrot.slane %v1186_v24, 9  ;;  %v2063_v31 = vcombine.low %v793_v17, %v807_v47  ;;  %v1160_v13 = vrot.slane %v1159_v26, 4  ;;  %v1230_v0 = vrot.slane %v1066_v16, 5  ;;  %v2368_v17 = vld [vmem:[#allocation2] sm:$0xf] }
 0x15f   : > { %v988_v12 = vor.u32 %v987_v60, %v984_v38  ;;  %v1222_v59 = vrot.slane %v2995_v32, 5  ;;  %v1164_v30 = vrot.slane %v1162_v48, 5  ;;  %v924_v56 = vsel %vm2814_vm13, %v2757_v53, %v2752_v49 }
 0x160   : > { %v938_v46 = vsel %vm2814_vm13, %v2759_v54, %v2761_v58  ;;  %v1226_v10 = vrot.slane %v3011_v25, 5  ;;  %1274 = vrot.lane.b32.xlu1 %v2063_v31, %s2441_s17  ;;  %v2071_v8 = vcombine.low %v3031_v15, %v874_v52  ;;  %v895_v32 = vrot.slane %v893_v21, 5  ;;  %v1184_v25 = vld [vmem:[#allocation2 + $0x30] sm:$0xe] }
 0x161   : > { %v3058_v9 = vcombine.low %v924_v56, %v938_v46  ;;  %v975_v3 = vrot.slane %v974_v42, 4  ;;  %v989_v43 = vrot.slane %v988_v12, 4  ;;  %v1165_v49 = vsel %vm2814_vm13, %v1160_v13, %v1164_v30  ;;  %v2370_v30 = vld [vmem:[%s3248_s2 + $0x88] sm:$0xff]  }
 0x162   : > { %v909_v53 = vrot.slane %v907_v34, 5  ;;  %v3068_v54 = vsel %vm2653_vm9, %v2054_v18, %v1230_v0  ;;  %v2087_v58 = vcombine.low %v1165_v49, %v1179_v39  ;;  %v896_v28 = vsel %vm2814_vm13, %v2878_v11, %v895_v32 }
 0x163   : > { %v2057_v21 = vcombine.low %v2902_v4, %v2918_v41  ;;  %v951_v15 = vrot.slane %v949_v2, 5  ;;  %v965_v7 = vrot.slane %v963_v37, 5  ;;  %v2058_v57 = vcombine.low %v2955_v20, %v2968_v61 }
 0x164   : > { %v910_v34 = vsel %vm2814_vm13, %v2852_v22, %v909_v53  ;;  %1322 = vrot.lane.b32.xlu1 %v2071_v8, %s2440_s14  ;;  %1402 = vrot.lane.b32.xlu0 %v2087_v58, %s2440_s14  ;;  %v979_v11 = vrot.slane %v977_v1, 5  ;;  %v993_v4 = vrot.slane %v991_v55, 5  ;;  %v2059_v22 = vcombine.low %v3016_v63, %v3021_v50  ;;  %s269_s14 = sand.u32 1, %s2429_s25  }
 0x165   : > { %v2072_v39 = vcombine.low %v896_v28, %v910_v34  ;;  %v952_v41 = vsel %vm2814_vm13, %v2935_v33, %v951_v15  ;;  %v966_v51 = vsel %vm2814_vm13, %v2943_v45, %v965_v7  ;;  %v2052_v27 = vrot.slane %v1184_v25, 9  ;;  %s2008_s17 = sshll.u32 %s269_s14, 5  ;;  %s3203_s19 = scalar_lea.sflag [#allocation4], %s269_s14 }
 0x166   : > { %v2053_v2 = vrot.slane %v1185_v62, 9  ;;  %v2074_v37 = vcombine.low %v952_v41, %v966_v51  ;;  %v980_v52 = vsel %vm2814_vm13, %v975_v3, %v979_v11  ;;  %v994_v44 = vsel %vm2814_vm13, %v989_v43, %v993_v4  ;;  %s3184_s9 = scalar_lea.vmem [#allocation3], %s2008_s17 }
 0x167   : > { %v2091_v1 = vcombine.low %v3068_v54, %v2847_v40  ;;  %v2075_v19 = vcombine.low %v980_v52, %v994_v44  ;;  %v3109_v33 = vsel %vm2653_vm9, %v2052_v27, %v1222_v59  ;;  %v2056_v60 = vcombine.low %v2368_v17, %v2833_v36  ;;  %v2369_v36 = vld [vmem:[%s3248_s2 + $0x80] sm:$0xff]   ;;  %s1942_s13 = sshll.u32 %s3184_s9, 4  ;;  %s3192_s13 = int_to_ptr.vmem [resolvable:$true] %s1942_s13 }
 0x168   : > { %v3113_v45 = vsel %vm2653_vm9, %v2053_v2, %v1226_v10  ;;  %v2362_v44 = vld [vmem:[%s3249_s3] sm:$0xff]   ;;  %p2382_p0 = scmp.lt.s32.totalorder %s3192_s13, %s2380_s22 }
 0x169   : > { %v2090_v23 = vcombine.low %v3109_v33, %v3113_v45  ;;  %2260 = vmatprep.subr.bf16.mxu0 %v2362_v44  ;;  %v2092_v40 = vld [vmem:[%s3251_s5] ss:$0 sm:$0xff] }
 0x16a   : > { %2261 = vmatpush3.bf16.msra.mxu0 %v2362_v44 }
 0x18e   : > { %v1319_v24 = vpop.permute.xlu1 %1318 }
 0x194   : > { %v1377_v5 = vpop.permute.xlu1 %1376 }
 0x198   : > { %v1351_v35 = vpop.permute.xlu0 %1350 }
 0x199   : > { %v1456_v10 = vsel %vm1416_vm10, %v3058_v9, %v1351_v35 }
 0x19c   : > { %v1317_v29 = vpop.permute.xlu1 %1316 }
 0x19f   : > { %v1349_v14 = vpop.permute.xlu0 %1348 }
 0x1a0   : > { %v1453_v42 = vsel %vm1416_vm10, %v2072_v39, %v1349_v14 }
 0x1a1   : > { %v1464_v31 = vsel %vm1429_vm14, %v1453_v42, %v1377_v5 }
 0x1a4   : > { %v1379_v38 = vpop.permute.xlu0 %1378 }
 0x1a5   : > { %v1466_v32 = vsel %vm1429_vm14, %v1456_v10, %v1379_v38 }
 0x1a7   : > { %v1289_v16 = vpop.permute.xlu1 %1288 }
 0x1ab   : > { %v1291_v26 = vpop.permute.xlu1 %1290 }
 0x1ae   : > { %v1269_v55 = vpop.permute.xlu0 %1268 }
 0x1af   : > { %v1419_v47 = vsel %vm1416_vm10, %v2056_v60, %v1269_v55  ;;  %v1321_v12 = vpop.permute.xlu1 %1320 }
 0x1b0   : > { %v1431_v48 = vsel %vm1429_vm14, %v1419_v47, %v1289_v16 }
 0x1b1   : > { %v1440_v0 = vsel %vm1438_vm15, %v1431_v48, %v1317_v29 }
 0x1b2   : > { %v1381_v6 = vpop.permute.xlu0 %1380 }
 0x1b6   : > { %v1397_v18 = vpop.permute.xlu0 %1396 }
 0x1b7   : > { %v1472_v13 = vsel %vm1438_vm15, %v1464_v31, %v1397_v18 }
 0x1b8   : > { %1678 = vmatprep.mubr.bf16.mxu1 %v1472_v13 }
 0x1b9   : > { %1679 = vmatmul.mubr.bf16.vlgmr.msra.gmra.mrb[0].mxu1 %v1440_v0 }
 0x1ba   : > { %2274 = vmatpush3.bf16.msra.mxu1 %v2369_v36  ;;  %v1353_v59 = vpop.permute.xlu0 %1352 }
 0x1bb   : > { %2273 = vmatprep.subr.bf16.mxu1 %v2370_v30  ;;  %v1459_v9 = vsel %vm1416_vm10, %v2074_v37, %v1353_v59 }
 0x1bc   : > { %v1271_v56 = vpop.permute.xlu1 %1270  ;;  %v1468_v34 = vsel %vm1429_vm14, %v1459_v9, %v1381_v6 }
 0x1bd   : > { %v1422_v46 = vsel %vm1416_vm10, %v2057_v21, %v1271_v56 }
 0x1be   : > { %2275 = vmatpush3.bf16.msra.mxu1 %v2370_v30  ;;  %v1433_v8 = vsel %vm1429_vm14, %v1422_v46, %v1291_v26 }
 0x1bf   : > { %v1399_v3 = vpop.permute.xlu0 %1398  ;;  %v1443_v53 = vsel %vm1438_vm15, %v1433_v8, %v1319_v24 }
 0x1c0   : > { %v1293_v43 = vpop.permute.xlu1 %1292  ;;  %v1475_v49 = vsel %vm1438_vm15, %v1466_v32, %v1399_v3 }
 0x1c1   : > { %1686 = vmatprep.mubr.bf16.mxu1 %v1475_v49 }
 0x1c2   : > { %1687 = vmatmul.mubr.bf16.gmra.mrb[4].mxu1 %v1443_v53 }
 0x1c4   : > { %v1355_v58 = vpop.permute.xlu0 %1354 }
 0x1c5   : > { %v1462_v61 = vsel %vm1416_vm10, %v2075_v19, %v1355_v58  ;;  %v2363_v19 = vld [vmem:[%s3249_s3 + $0x8] sm:$0xff]  }
 0x1c6   : > { %2262 = vmatprep.subr.bf16.mxu0 %v2363_v19 }
 0x1c7   : > { %v1273_v28 = vpop.permute.xlu1 %1272  ;;  %2263 = vmatpush3.bf16.msra.mxu0 %v2363_v19 }
 0x1c8   : > { %v1425_v21 = vsel %vm1416_vm10, %v2058_v57, %v1273_v28 }
 0x1c9   : > { %v1435_v25 = vsel %vm1429_vm14, %v1425_v21, %v1293_v43 }
 0x1ca   : > { %v1446_v39 = vsel %vm1438_vm15, %v1435_v25, %v1321_v12 }
 0x1cb   : > { %v1401_v62 = vpop.permute.xlu0 %1400  ;;  %v1295_v15 = vpop.permute.xlu1 %1294 }
 0x1cc   : > { %v1478_v7 = vsel %vm1438_vm15, %v1468_v34, %v1401_v62 }
 0x1cd   : > { %1694 = vmatprep.mubr.bf16.mxu1 %v1478_v7 }
 0x1ce   : > { %1695 = vmatmul.mubr.bf16.gmra.mrb[8].mxu1 %v1446_v39 }
 0x1cf   : > { %v1383_v11 = vpop.permute.xlu0 %1382 }
 0x1d0   : > { %v1470_v57 = vsel %vm1429_vm14, %v1462_v61, %v1383_v11 }
 0x1d2   : > { %v1275_v4 = vpop.permute.xlu1 %1274 }
 0x1d3   : > { %v1428_v20 = vsel %vm1416_vm10, %v2059_v22, %v1275_v4 }
 0x1d4   : > { %v1437_v2 = vsel %vm1429_vm14, %v1428_v20, %v1295_v15 }
 0x1d6   : > { %v1323_v41 = vpop.permute.xlu1 %1322  ;;  %v1403_v51 = vpop.permute.xlu0 %1402 }
 0x1d7   : > { %v1481_v27 = vsel %vm1438_vm15, %v1470_v57, %v1403_v51  ;;  %v1449_v37 = vsel %vm1438_vm15, %v1437_v2, %v1323_v41 }
 0x1d8   : > { %1702 = vmatprep.mubr.bf16.mxu1 %v1481_v27 }
 0x1d9   : > { %1703 = vmatmul.mubr.bf16.gmra.mrb[12].mxu1 %v1449_v37  ;;  %v2115_v37 = vld [vmem:[%s3252_s6] ss:$0 sm:$0xff] }
 0x1da   : > { %2256 = vmatprep.mubr.msk.bf16.mxu1 %vm1416_vm10, %v2090_v23 }
 0x1e1   : > { %2257 = vmatmul.mubr.msk.bf16.vlgmr.msra.gmra.mrb[16].mxu1 %vm1416_vm10, %v2091_v1 }
 0x204   : > { %v2254_v63 = vpop.f32.mrb[8].mxu0 }
 0x205   : > { %v1745_v50 = vpop.f32.mrb[9].mxu0 }
 0x206   : > { %v2255_v22 = vpop.f32.mrb[10].mxu0 }
 0x207   : > { %v1748_v52 = vpop.f32.mrb[11].mxu0 }
 0x28c   : > { %v2188_v33 = vpop.f32.mrb[0].mxu1 }
 0x28d   : > { %v2189_v54 = vpop.f32.mrb[1].mxu1 }
 0x28e   : > { %v2190_v1 = vadd.f32 %v2189_v54, %v2188_v33  ;;  %v2191_v45 = vpop.f32.mrb[2].mxu1 }
 0x28f   : > { %v2192_v23 = vpop.f32.mrb[3].mxu1 }
 0x290   : > { %v1681_v24 = vadd.f32 %v2190_v1, %v2092_v40  ;;  %v2193_v35 = vadd.f32 %v2192_v23, %v2191_v45 }
 0x292   : > { %v1746_v5 = vadd.f32 %v1745_v50, %v1681_v24  ;;  %v1684_v14 = vadd.f32 %v2193_v35, %v2092_v40 }
 0x294   : > { %v1749_v29 = vadd.f32 %v1748_v52, %v1684_v14  ;;  %v1776_v38 = vmax.f32 %v1746_v5, 0.0 }
 0x295   : > { %v2194_v55 = vpop.f32.mrb[4].mxu1 }
 0x296   : > { %v1777_v16 = vmax.f32 %v1749_v29, 0.0  ;;  %v2195_v17 = vpop.f32.mrb[5].mxu1 }
 0x297   : > { %v2196_v26 = vadd.f32 %v2195_v17, %v2194_v55  ;;  %v2197_v47 = vpop.f32.mrb[6].mxu1 }
 0x298   : > { %v1784_v60 = vpack.c.bf16 %v1777_v16, %v1776_v38  ;;  %v2198_v6 = vpop.f32.mrb[7].mxu1 }
 0x299   : > { %v1689_v42 = vadd.f32 %v2196_v26, %v2092_v40  ;;  %v2199_v48 = vadd.f32 %v2198_v6, %v2197_v47  ;;  %v2373_v6 = vld [vmem:[%s2547_s23 + $0x18] sm:$0xff]  }
 0x29a   : > { %2264 = vmatprep.mubr.msk.bf16.mxu0 %vm1416_vm10, %v1784_v60 }
 0x29b   : > { %v1754_v18 = vadd.f32 %v2254_v63, %v1689_v42  ;;  %v1692_v31 = vadd.f32 %v2199_v48, %v2092_v40  ;;  %v2371_v63 = vld [vmem:[%s2547_s23 + $0x8] sm:$0xff]   ;;  %v1894_v42 = vunpack.c.l.bf16 %v2373_v6 }
 0x29c   : > { %v1890_v50 = vunpack.c.l.bf16 %v2371_v63 }
 0x29d   : > { %v1757_v12 = vadd.f32 %v2255_v22, %v1692_v31  ;;  %v1778_v13 = vmax.f32 %v1754_v18, 0.0  ;;  %v2372_v22 = vld [vmem:[%s2547_s23] sm:$0xff]   ;;  %v2374_v18 = vld [vmem:[%s2547_s23 + $0x10] sm:$0xff]   ;;  %s2136_s23 = sshll.u32 %s2506_s28, 9  ;;  %s2375_s28 = scalar_lea.vmem %s3192_s13, 512 }
 0x29e   : > { %v1888_v52 = vunpack.c.l.bf16 %v2372_v22  ;;  %v1889_v54 = vunpack.c.h.bf16 %v2372_v22  ;;  %v1892_v31 = vunpack.c.l.bf16 %v2374_v18  ;;  %s3197_s18 = scalar_lea.hbm %s3253_s7, %s2136_s23  ;;  %p2376_p11 = scmp.ne.s32.totalorder %s3192_s13, %s2375_s28 }
 0x29f   : > { %v1779_v0 = vmax.f32 %v1757_v12, 0.0  ;;  %p2383_p1 = scmp.lt.s32.totalorder %s2381_s29, %s2375_s28 }
 0x2a0   : > { %p2377_p12 = pnand %p2376_p11, %p2523_p5 }
 0x2a1   : > { %v1785_v36 = vpack.c.bf16 %v1779_v0, %v1778_v13  ;;  %v2200_v59 = vpop.f32.mrb[8].mxu1  ;;  %v1895_v0 = vunpack.c.h.bf16 %v2373_v6  ;;  %p2384_p2 = por %p2383_p1, %p2382_p0 }
 0x2a2   : > { %v2201_v30 = vpop.f32.mrb[9].mxu1  ;;  %p2378_p13 = pneg %p2377_p12 }
 0x2a3   : > { %v2202_v56 = vadd.f32 %v2201_v30, %v2200_v59  ;;  %v2203_v46 = vpop.f32.mrb[10].mxu1  ;;  %2265 = vmatmul.mubr.msk.bf16.vlgmr.msra.gmra.mrb[12].mxu0 %vm1416_vm10, %v1785_v36  ;;  %v1893_v30 = vunpack.c.h.bf16 %v2374_v18 }
 0x2a4   : > { %v2204_v10 = vpop.f32.mrb[11].mxu1  ;;  %p2385_p3 = pnand %p2384_p2, %p2378_p13 }
 0x2a5   : > { %v2205_v8 = vadd.f32 %v2204_v10, %v2203_v46  ;;  %v1697_v9 = vadd.f32 %v2202_v56, %v2092_v40 }
 0x2a7   : > { %v1700_v39 = vadd.f32 %v2205_v8, %v2092_v40 }
 0x2ac   : > { %v2206_v32 = vpop.f32.mrb[12].mxu1 }
 0x2ad   : > { %v2207_v3 = vpop.f32.mrb[13].mxu1 }
 0x2ae   : > { %v2208_v43 = vadd.f32 %v2207_v3, %v2206_v32  ;;  %v2209_v49 = vpop.f32.mrb[14].mxu1 }
 0x2af   : > { %v2210_v53 = vpop.f32.mrb[15].mxu1 }
 0x2b0   : > { %v2211_v58 = vadd.f32 %v2210_v53, %v2209_v49  ;;  %v1705_v28 = vadd.f32 %v2208_v43, %v2092_v40 }
 0x2b2   : > { %v1708_v34 = vadd.f32 %v2211_v58, %v2092_v40  ;;  %v1891_v40 = vunpack.c.h.bf16 %v2371_v63 }
 0x2b4   : > { %v2258_v21 = vpop.f32.mrb[16].mxu1 }
 0x2b5   : > { %v1770_v25 = vadd.f32 %v2258_v21, %v1705_v28  ;;  %v1761_v62 = vpop.f32.mrb[17].mxu1 }
 0x2b6   : > { %v1762_v15 = vadd.f32 %v1761_v62, %v1697_v9  ;;  %v2259_v7 = vpop.f32.mrb[18].mxu1 }
 0x2b7   : > { %v1773_v11 = vadd.f32 %v2259_v7, %v1708_v34  ;;  %v1764_v4 = vpop.f32.mrb[19].mxu1  ;;  %v1782_v61 = vmax.f32 %v1770_v25, 0.0 }
 0x2b8   : > { %v1765_v20 = vadd.f32 %v1764_v4, %v1700_v39  ;;  %v1780_v41 = vmax.f32 %v1762_v15, 0.0 }
 0x2b9   : > { %v1783_v57 = vmax.f32 %v1773_v11, 0.0 }
 0x2ba   : > { %v1781_v51 = vmax.f32 %v1765_v20, 0.0 }
 0x2bb   : > { %v1787_v27 = vpack.c.bf16 %v1783_v57, %v1782_v61 }
 0x2bc   : > { %v1786_v2 = vpack.c.bf16 %v1781_v51, %v1780_v41 }
 0x2be   : > { %2268 = vmatprep.mubr.msk.bf16.mxu0 %vm1416_vm10, %v1786_v2 }
 0x2bf   : > { %2269 = vmatmul.mubr.msk.bf16.gmra.mrb[16].mxu0 %vm1416_vm10, %v1787_v27 }
 0x376   : > { %v2266_v44 = vpop.f32.mrb[12].mxu0 }
 0x377   : > { %v1866_v19 = vadd.f32 %v2266_v44, %v2115_v37  ;;  %v1857_v33 = vpop.f32.mrb[13].mxu0 }
 0x378   : > { %v1858_v1 = vadd.f32 %v2115_v37, %v1857_v33  ;;  %v2267_v45 = vpop.f32.mrb[14].mxu0 }
 0x379   : > { %v1898_v23 = vadd.f32 %v1890_v50, %v1866_v19  ;;  %v1869_v24 = vadd.f32 %v2267_v45, %v2115_v37  ;;  %v1860_v35 = vpop.f32.mrb[15].mxu0 }
 0x37a   : > { %v1896_v5 = vadd.f32 %v1888_v52, %v1858_v1  ;;  %v1861_v14 = vadd.f32 %v2115_v37, %v1860_v35 }
 0x37b   : > { %v1899_v29 = vadd.f32 %v1891_v40, %v1869_v24  ;;  %v1906_v16 = vmax.f32 %v1898_v23, 0.0 }
 0x37c   : > { %v1897_v38 = vadd.f32 %v1889_v54, %v1861_v14  ;;  %v1904_v17 = vmax.f32 %v1896_v5, 0.0 }
 0x37d   : > { %v1907_v55 = vmax.f32 %v1899_v29, 0.0 }
 0x37e   : > { %v1905_v60 = vmax.f32 %v1897_v38, 0.0 }
 0x37f   : > { %v2145_v26 = vpack.c.bf16 %v1907_v55, %v1906_v16 }
 0x380   : > { %v2140_v47 = vpack.c.bf16 %v1905_v60, %v1904_v17 }
 0x381   : > { %2157 = vst [vmem:[%s3184_s9 + $0x8] sm:$0xff] %v2145_v26  }
 0x382   : > { %2141 = vst [vmem:[%s3184_s9] sm:$0xff] %v2140_v47  }
 0x392   : > { %v2270_v48 = vpop.f32.mrb[16].mxu0 }
 0x393   : > { %v1882_v12 = vadd.f32 %v2270_v48, %v2115_v37  ;;  %v1873_v13 = vpop.f32.mrb[17].mxu0 }
 0x394   : > { %v1874_v36 = vadd.f32 %v2115_v37, %v1873_v13  ;;  %v2271_v59 = vpop.f32.mrb[18].mxu0 }
 0x395   : > { %v1902_v56 = vadd.f32 %v1894_v42, %v1882_v12  ;;  %v1885_v46 = vadd.f32 %v2271_v59, %v2115_v37  ;;  %v1876_v10 = vpop.f32.mrb[19].mxu0 }
 0x396   : > { %v1900_v8 = vadd.f32 %v1892_v31, %v1874_v36  ;;  %v1877_v32 = vadd.f32 %v2115_v37, %v1876_v10 }
 0x397   : > { %v1903_v3 = vadd.f32 %v1895_v0, %v1885_v46  ;;  %v1910_v49 = vmax.f32 %v1902_v56, 0.0 }
 0x398   : > { %v1901_v43 = vadd.f32 %v1893_v30, %v1877_v32  ;;  %v1908_v58 = vmax.f32 %v1900_v8, 0.0 }
 0x399   : > { %v1911_v53 = vmax.f32 %v1903_v3, 0.0 }
 0x39a   : > { %v1909_v28 = vmax.f32 %v1901_v43, 0.0 }
 0x39b   : > { %v2155_v21 = vpack.c.bf16 %v1911_v53, %v1910_v49 }
 0x39c   : > { %v2150_v9 = vpack.c.bf16 %v1909_v28, %v1908_v58 }
 0x39d   : > { %2159 = vst [vmem:[%s3184_s9 + $0x18] sm:$0xff] %v2155_v21  }
 0x39e   : > { %2158 = vst [vmem:[%s3184_s9 + $0x10] sm:$0xff] %v2150_v9  }
 0x39f   : > { %2388 = shalt.err (!%p2385_p3)
}
 0x3a0   : > { %s2389_s8 = scalar_lea.hbm %s3197_s18, 512  ;;  %s2393_s9 = scalar_lea.hbm %s3253_s7, 1024 }
 0x3a1   : > { %p2390_p4 = scmp.ne.s32.totalorder %s3197_s18, %s2389_s8  ;;  %p2394_p9 = scmp.lt.u32.totalorder %s3197_s18, %s3253_s7 }
 0x3a2   : > { %p2395_p10 = scmp.lt.u32.totalorder %s2393_s9, %s2389_s8  ;;  %p2397_p12 = scmp.lt.u32.totalorder %s2389_s8, %s3197_s18 }
 0x3a3   : > { %p2391_p7 = pnand %p2390_p4, %p2523_p5 }
 0x3a4   : > { %p2396_p11 = por %p2395_p10, %p2394_p9 }
 0x3a5   : > { %p2392_p8 = pneg %p2391_p7 }
 0x3a6   : > { %p2398_p13 = por %p2397_p12, %p2396_p11 }
 0x3a8   : > { %p2399_p0 = pnand %p2398_p13, %p2392_p8 }
 0x3aa   : > { %2402 = shalt.err (!%p2399_p0)
}
 0x3ab   : > { %s2444_s16 = smov 4  }
 0x3ac   : > { %2276 = dma.vmem_to_hbm [thread:$0]  (%p2523_p5), %s3192_s13, 512, %s3197_s18, %s3203_s19, %s2442_s20, %s2442_s20, %s2444_s16  }
 0x3ad PF: > { %p2282_p1 = scmp.ge.s32.totalorder %s2437_s27, 2  ;;  %s1957_s28 = sand.u32 1, %s2425_s24  }
 0x3ae   : > { %s1958_s21 = scalar_lea.sflag [#allocation4], %s1957_s28 }
 0x3af   : > { %p2279_p2 = pnand %p2282_p1, %p2527_p6 }
 0x3b1   : > { %2420 = dma.done.wait (!%p2279_p2), %s1958_s21, 512  }
 0x3b2   : > { %2422 = vsyncadd (!%p2279_p2), %s1958_s21, 4294966784  ;;  %p17_p3 = scmp.ge.s32.totalorder %s2510_s30, 4   ;;  %s3266_s24 = smov %s2429_s25 }
 0x3b3   : > { %s3267_s25 = smov %s2433_s26  ;;  %s3268_s26 = smov %s2521_s10 }
 0x3b4   : > { %s3269_s27 = smov %s2510_s30  ;;  %19 = sbr.rel (!%p17_p3) target bundleno = 3 (0x3), region = 86 }
 0x3bb   :  { %1963 = vsyncpa [#allocation4], 1 }
 0x3bc   :  { %1965 = vsyncpa [#allocation4 + $0x1], 1 }

</bundles_post_ra>
